<compile_context>
chip_gen: v5e
topology: v5e:2x2
jax: 0.10.0
libtpu: 0.0.40
codegen_flags: <defaults>
</compile_context>

<pallas_src>
import math

import jax
import jax.numpy as jnp
from jax.experimental import pallas as pl
from jax.experimental.pallas import tpu as pltpu

_LANE = 128


def _round_up(n, m):
    return ((n + m - 1) // m) * m


def _pad_to(a, shape):
    pads = [(0, s - d) for d, s in zip(a.shape, shape)]
    return jnp.pad(a, pads)


# ----------------------------------------------------------------------------
# In-kernel math helpers (all f32 on the VPU/EUP; bf16 only touches the MXU)
# ----------------------------------------------------------------------------
def _fast_recip(x):
    # EUP approximate reciprocal + one Newton-Raphson step: near-f32-exact,
    # keeps the divide off the VALU slots.  NOTE: assumes x != 0 -- true for
    # the erf denominator below (all q coefficients negative, x^2 >= 0).
    r = pl.reciprocal(x, approx=True)
    return r * (2.0 - x * r)


def _erf_f32(x):
    """Eigen/XLA-style rational erf approximation (error ~1e-7, well inside
    the 1e-3 tolerance vs PyTorch's exact erf)."""
    x = jnp.clip(x, -4.0, 4.0)
    x2 = x * x
    p = jnp.float32(-2.72614225801306e-10)
    p = p * x2 + jnp.float32(2.77068142495902e-08)
    p = p * x2 + jnp.float32(-2.10102402082508e-06)
    p = p * x2 + jnp.float32(-5.69250639462346e-05)
    p = p * x2 + jnp.float32(-7.34990630326855e-04)
    p = p * x2 + jnp.float32(-2.95459980854025e-03)
    p = p * x2 + jnp.float32(-1.60960333262415e-02)
    p = p * x
    q = jnp.float32(-1.45660718464996e-05)
    q = q * x2 + jnp.float32(-2.13374055278905e-04)
    q = q * x2 + jnp.float32(-1.68282697438203e-03)
    q = q * x2 + jnp.float32(-7.37332916720468e-03)
    q = q * x2 + jnp.float32(-1.42647390514189e-02)
    return p * _fast_recip(q)


def _gelu_exact(x):
    """PyTorch nn.GELU() default (erf formulation): 0.5*x*(1+erf(x/sqrt(2)))."""
    return 0.5 * x * (1.0 + _erf_f32(x * jnp.float32(1.0 / math.sqrt(2.0))))


# ----------------------------------------------------------------------------
# Pallas kernel: full ResDenoiseNet forward for one batch tile
# ----------------------------------------------------------------------------
def _make_kernel(H, D_OUT, t_col):
    """H / D_OUT / t_col are static (lane-aligned) Python ints."""

    def kernel(x_ref, tbl_ref, w1_ref, w2_ref, w3_ref, w4_ref, o_ref):
        w_dtype = w1_ref.dtype

        x = x_ref[...]                       # f32 (tile, D_IN); t stashed at col t_col
        t = x[:, t_col:t_col + 1]            # (tile, 1) timestep

        # Packed constant table rows: 0 freq, 1 phase, 2..5 b1..b4.
        # Fused sinusoidal embedding: concat(sin(tf), cos(tf)) == sin(tf + phase);
        # padded lanes have freq = phase = 0 -> sin(0) = 0, so padding stays exact.
        t_emb = jnp.sin(t * tbl_ref[0:1, :H] + tbl_ref[1:2, :H])

        # h = fc1(x_cat) + t_emb  (b1 folded into the same add; w1 row t_col is 0)
        h = jnp.dot(x.astype(w_dtype), w1_ref[...],
                    preferred_element_type=jnp.float32)
        h = h + (t_emb + tbl_ref[2:3, :H])

        # res_block = Linear -> GELU(exact) -> Linear ; then residual add
        r = jnp.dot(h.astype(w_dtype), w2_ref[...],
                    preferred_element_type=jnp.float32) + tbl_ref[3:4, :H]
        r = _gelu_exact(r)
        r = jnp.dot(r.astype(w_dtype), w3_ref[...],
                    preferred_element_type=jnp.float32) + tbl_ref[4:5, :H]
        h = h + r

        # output projection
        out = jnp.dot(h.astype(w_dtype), w4_ref[...],
                      preferred_element_type=jnp.float32) + tbl_ref[5:6, :D_OUT]
        o_ref[...] = out.astype(o_ref.dtype)

    return kernel


# ----------------------------------------------------------------------------
# Tiling choice
# ----------------------------------------------------------------------------
def _choose_batch_tile(B):
    # Overhead-bound at small/medium B: a single grid step avoids the
    # ~0.35us/step pipeline cost and any duplicated weight DMA.
    if B <= 512:
        return B
    # Large B: MXU-friendly row tiles (256-wide MXU on v6e/v7x).
    # TODO(synk): make this core-aware (pltpu.CORE_PARALLEL) on v7x once the
    # per-step work is large enough to amortize per-core weight DMA.
    for tile in (512, 256, 128):
        if B % tile == 0:
            return tile
    for tile in range(512, 7, -8):
        if B % tile == 0:
            return tile
    return B


# ----------------------------------------------------------------------------
# One-time parameter preparation (hoisted out of the denoising loop)
# ----------------------------------------------------------------------------
def prepare_params(params, *, use_bf16=False):
    d_in, hidden = params["w1"].shape
    input_dim = params["w4"].shape[1]
    half = hidden // 2
    assert half >= 2, "sinusoidal embedding needs hidden >= 4 (divides by half-1)"

    D_IN = _round_up(d_in + 1, _LANE)     # +1 spare zero lane to stash the timestep
    H = _round_up(hidden, _LANE)
    D_OUT = _round_up(input_dim, _LANE)
    L = max(H, D_OUT)

    op_dtype = jnp.bfloat16 if use_bf16 else jnp.float32

    # Lane-padded matmul operands (padding is exact: padded rows/cols are zero).
    w1 = _pad_to(params["w1"].astype(jnp.float32), (D_IN, H)).astype(op_dtype)
    w2 = _pad_to(params["w2"].astype(jnp.float32), (H, H)).astype(op_dtype)
    w3 = _pad_to(params["w3"].astype(jnp.float32), (H, H)).astype(op_dtype)
    w4 = _pad_to(params["w4"].astype(jnp.float32), (H, D_OUT)).astype(op_dtype)

    # Packed (8, L) constant table: freq, phase, b1, b2, b3, b4 (rows 6-7 zero).
    freqs = jnp.exp(jnp.arange(half, dtype=jnp.float32)
                    * (-math.log(10000.0) / (half - 1)))
    freq_row = jnp.concatenate([freqs, freqs])
    phase_row = jnp.concatenate([jnp.zeros((half,), jnp.float32),
                                 jnp.full((half,), 0.5 * math.pi, jnp.float32)])
    tbl = jnp.zeros((8, L), jnp.float32)
    tbl = tbl.at[0, :hidden].set(freq_row)
    tbl = tbl.at[1, :hidden].set(phase_row)
    tbl = tbl.at[2, :hidden].set(params["b1"].astype(jnp.float32))
    tbl = tbl.at[3, :hidden].set(params["b2"].astype(jnp.float32))
    tbl = tbl.at[4, :hidden].set(params["b3"].astype(jnp.float32))
    tbl = tbl.at[5, :input_dim].set(params["b4"].astype(jnp.float32))

    return dict(w1=w1, w2=w2, w3=w3, w4=w4, tbl=tbl,
                d_in=d_in, hidden=hidden, input_dim=input_dim,
                D_IN=D_IN, H=H, D_OUT=D_OUT, L=L, t_col=d_in)


# ----------------------------------------------------------------------------
# Forward wrapper
# ----------------------------------------------------------------------------
def res_denoise_net(x_cat, t, prep, *, batch_tile=None):
    B, d_in = x_cat.shape
    assert d_in == prep["d_in"]
    D_IN, H, D_OUT, L = prep["D_IN"], prep["H"], prep["D_OUT"], prep["L"]
    input_dim, t_col = prep["input_dim"], prep["t_col"]

    if batch_tile is None:
        batch_tile = _choose_batch_tile(B)
    assert B % batch_tile == 0

    # x tile with the timestep folded into the first zero-padded lane (col t_col).
    # Kept f32 so t (magnitude up to ~1e3) keeps full precision for sin(t*f).
    pad = jnp.zeros((B, D_IN - d_in - 1), jnp.float32)
    xp = jnp.concatenate(
        [x_cat.astype(jnp.float32), t.astype(jnp.float32).reshape(B, 1), pad],
        axis=1)

    def const_spec(shape):
        # Grid-invariant operands: single-buffer (double-buffering a block whose
        # index never changes only doubles VMEM + descriptor bookkeeping).
        return pl.BlockSpec(shape, lambda i: (0, 0), pipeline_mode=pl.Buffered(1))

    kernel = _make_kernel(H, D_OUT, t_col)

    out = pl.pallas_call(
        kernel,
        out_shape=jax.ShapeDtypeStruct((B, D_OUT), jnp.float32),
        grid_spec=pltpu.PrefetchScalarGridSpec(
            num_scalar_prefetch=0,
            grid=(B // batch_tile,),
            in_specs=[
                pl.BlockSpec((batch_tile, D_IN), lambda i: (i, 0)),  # x (+t lane)
                const_spec((8, L)),                                   # freq/phase/b1..b4
                const_spec((D_IN, H)),                                # w1
                const_spec((H, H)),                                   # w2
                const_spec((H, H)),                                   # w3
                const_spec((H, D_OUT)),                               # w4
            ],
            out_specs=pl.BlockSpec((batch_tile, D_OUT), lambda i: (i, 0)),
        ),
        compiler_params=pltpu.CompilerParams(
            dimension_semantics=("arbitrary",)),
    )(xp, prep["tbl"], prep["w1"], prep["w2"], prep["w3"], prep["w4"])

    return out[:, :input_dim].astype(x_cat.dtype)


def make_denoiser(params, *, use_bf16=False, batch_tile=None):
    """Pad/cast parameters once, return a jitted apply(x_cat, t) -> out."""
    prep = prepare_params(params, use_bf16=use_bf16)

    def apply(x_cat, t):
        return res_denoise_net(x_cat, t, prep, batch_tile=batch_tile)

    return jax.jit(apply)


# ----------------------------------------------------------------------------
# Deterministic parameter init (PyTorch Linear default: U(-1/sqrt(fan_in), ..))
# ----------------------------------------------------------------------------
def init_params(key, input_dim, cond_dim, hidden):
    d_in = input_dim + cond_dim
    keys = jax.random.split(key, 8)

    def linear(kw, kb, fan_in, fan_out):
        bound = 1.0 / math.sqrt(fan_in)
        w = jax.random.uniform(kw, (fan_in, fan_out), jnp.float32, -bound, bound)
        b = jax.random.uniform(kb, (fan_out,), jnp.float32, -bound, bound)
        return w, b

    w1, b1 = linear(keys[0], keys[1], d_in, hidden)
    w2, b2 = linear(keys[2], keys[3], hidden, hidden)
    w3, b3 = linear(keys[4], keys[5], hidden, hidden)
    w4, b4 = linear(keys[6], keys[7], hidden, input_dim)
    return dict(w1=w1, b1=b1, w2=w2, b2=b2, w3=w3, b3=b3, w4=w4, b4=b4)


# ----------------------------------------------------------------------------
# Pure-JAX reference for validation
# ----------------------------------------------------------------------------
def sinusoidal_time_embedding(t, dim):
    half_dim = dim // 2
    freqs = jnp.exp(jnp.arange(half_dim, dtype=jnp.float32)
                    * (-math.log(10000.0) / (half_dim - 1)))
    emb = t.astype(jnp.float32)[:, None] * freqs[None, :]
    return jnp.concatenate([jnp.sin(emb), jnp.cos(emb)], axis=1)


def reference(x_cat, t, params):
    hidden = params["w1"].shape[1]
    t_emb = sinusoidal_time_embedding(t, hidden)
    h = x_cat @ params["w1"] + params["b1"] + t_emb
    r = h @ params["w2"] + params["b2"]
    r = jax.nn.gelu(r, approximate=False)
    r = r @ params["w3"] + params["b3"]
    h = h + r
    return h @ params["w4"] + params["b4"]


if __name__ == "__main__":
    INPUT_DIM, COND_DIM, HIDDEN, BATCH = 16, 16, 32, 64

    key = jax.random.PRNGKey(0)
    k_params, k_x, k_t = jax.random.split(key, 3)

    params = init_params(k_params, INPUT_DIM, COND_DIM, HIDDEN)
    x_cat = jax.random.normal(k_x, (BATCH, INPUT_DIM + COND_DIM), jnp.float32)
    t = jax.random.uniform(k_t, (BATCH,), jnp.float32, 0.0, 1000.0)

    ref = jax.block_until_ready(reference(x_cat, t, params))

    # Default path: f32 matmul operands, exact parity with the PyTorch module.
    denoise = make_denoiser(params)
    out = jax.block_until_ready(denoise(x_cat, t))
    assert out.shape == (BATCH, INPUT_DIM)
    assert jnp.max(jnp.abs(out - ref)) < 1e-3, "f32 kernel mismatch vs reference"

    # bf16 MXU operands (f32 accumulate, f32 elementwise math): validated at a
    # loose tolerance appropriate for bf16 rounding of activations/weights.
    denoise_bf16 = make_denoiser(params, use_bf16=True)
    out_bf16 = jax.block_until_ready(denoise_bf16(x_cat, t))
    assert jnp.max(jnp.abs(out_bf16 - ref)) < 1e-1, "bf16 kernel mismatch vs reference"

    print("KERNEL_OK")
</pallas_src>

<mosaic_0001>
module attributes {stable_mosaic.version = 11 : i64} {
  func.func @kernel(%arg0: i32, %arg1: memref<64x128xf32, #tpu.memory_space<vmem>>, %arg2: memref<8x128xf32, #tpu.memory_space<vmem>>, %arg3: memref<128x128xf32, #tpu.memory_space<vmem>>, %arg4: memref<128x128xf32, #tpu.memory_space<vmem>>, %arg5: memref<128x128xf32, #tpu.memory_space<vmem>>, %arg6: memref<128x128xf32, #tpu.memory_space<vmem>>, %arg7: memref<64x128xf32, #tpu.memory_space<vmem>>) attributes {dimension_semantics = [#tpu.dimension_semantics<arbitrary>], iteration_bounds = array<i64: 1>, scalar_prefetch = 0 : i64, scratch_operands = 0 : i64, tpu.core_type = #tpu.core_type<tc>, window_params = [{transform_indices = @transform_0, window_bounds = array<i64: 64, 128>}, {pipeline_mode = #tpu.pipeline_mode<synchronous>, transform_indices = @transform_1, window_bounds = array<i64: 8, 128>}, {pipeline_mode = #tpu.pipeline_mode<synchronous>, transform_indices = @transform_2, window_bounds = array<i64: 128, 128>}, {pipeline_mode = #tpu.pipeline_mode<synchronous>, transform_indices = @transform_3, window_bounds = array<i64: 128, 128>}, {pipeline_mode = #tpu.pipeline_mode<synchronous>, transform_indices = @transform_4, window_bounds = array<i64: 128, 128>}, {pipeline_mode = #tpu.pipeline_mode<synchronous>, transform_indices = @transform_5, window_bounds = array<i64: 128, 128>}, {transform_indices = @transform_6, window_bounds = array<i64: 64, 128>}]} {
    %c0 = arith.constant 0 : index
    %c0_0 = arith.constant 0 : index
    %0 = vector.load %arg1[%c0, %c0_0] : memref<64x128xf32, #tpu.memory_space<vmem>>, vector<64x128xf32>
    %1 = vector.extract_strided_slice %0 {offsets = [0, 32], sizes = [64, 1], strides = [1, 1]} : vector<64x128xf32> to vector<64x1xf32>
    %c0_1 = arith.constant 0 : index
    %c0_2 = arith.constant 0 : index
    %2 = vector.load %arg2[%c0_1, %c0_2] : memref<8x128xf32, #tpu.memory_space<vmem>>, vector<1x128xf32>
    %3 = vector.broadcast %1 : vector<64x1xf32> to vector<64x128xf32>
    %4 = vector.broadcast %2 : vector<1x128xf32> to vector<64x128xf32>
    %5 = arith.mulf %3, %4 : vector<64x128xf32>
    %c1 = arith.constant 1 : index
    %c0_3 = arith.constant 0 : index
    %6 = vector.load %arg2[%c1, %c0_3] : memref<8x128xf32, #tpu.memory_space<vmem>>, vector<1x128xf32>
    %7 = vector.broadcast %6 : vector<1x128xf32> to vector<64x128xf32>
    %8 = arith.addf %5, %7 : vector<64x128xf32>
    %9 = math.sin %8 : vector<64x128xf32>
    %c0_4 = arith.constant 0 : index
    %c0_5 = arith.constant 0 : index
    %10 = vector.load %arg3[%c0_4, %c0_5] : memref<128x128xf32, #tpu.memory_space<vmem>>, vector<128x128xf32>
    %cst = arith.constant dense<0.000000e+00> : vector<64x128xf32>
    %11 = tpu.matmul %0, %10, %cst {dimension_numbers = #tpu.dot_dimension_numbers<[1], [0], [0], [1], [0, 0, 1, 1], [], []>} : vector<64x128xf32>, vector<128x128xf32>, vector<64x128xf32> -> vector<64x128xf32>
    %c2 = arith.constant 2 : index
    %c0_6 = arith.constant 0 : index
    %12 = vector.load %arg2[%c2, %c0_6] : memref<8x128xf32, #tpu.memory_space<vmem>>, vector<1x128xf32>
    %13 = vector.broadcast %12 : vector<1x128xf32> to vector<64x128xf32>
    %14 = arith.addf %9, %13 : vector<64x128xf32>
    %15 = arith.addf %11, %14 : vector<64x128xf32>
    %c0_7 = arith.constant 0 : index
    %c0_8 = arith.constant 0 : index
    %16 = vector.load %arg4[%c0_7, %c0_8] : memref<128x128xf32, #tpu.memory_space<vmem>>, vector<128x128xf32>
    %cst_9 = arith.constant dense<0.000000e+00> : vector<64x128xf32>
    %17 = tpu.matmul %15, %16, %cst_9 {dimension_numbers = #tpu.dot_dimension_numbers<[1], [0], [0], [1], [0, 0, 1, 1], [], []>} : vector<64x128xf32>, vector<128x128xf32>, vector<64x128xf32> -> vector<64x128xf32>
    %c3 = arith.constant 3 : index
    %c0_10 = arith.constant 0 : index
    %18 = vector.load %arg2[%c3, %c0_10] : memref<8x128xf32, #tpu.memory_space<vmem>>, vector<1x128xf32>
    %19 = vector.broadcast %18 : vector<1x128xf32> to vector<64x128xf32>
    %20 = arith.addf %17, %19 : vector<64x128xf32>
    %cst_11 = arith.constant 5.000000e-01 : f32
    %21 = vector.broadcast %cst_11 : f32 to vector<64x128xf32>
    %22 = arith.mulf %21, %20 : vector<64x128xf32>
    %cst_12 = arith.constant 0.707106769 : f32
    %23 = vector.broadcast %cst_12 : f32 to vector<64x128xf32>
    %24 = arith.mulf %20, %23 : vector<64x128xf32>
    %cst_13 = arith.constant -4.000000e+00 : f32
    %cst_14 = arith.constant 4.000000e+00 : f32
    %25 = vector.broadcast %cst_13 : f32 to vector<64x128xf32>
    %26 = arith.maximumf %25, %24 : vector<64x128xf32>
    %27 = vector.broadcast %cst_14 : f32 to vector<64x128xf32>
    %28 = arith.minimumf %27, %26 : vector<64x128xf32>
    %29 = arith.mulf %28, %28 : vector<64x128xf32>
    %cst_15 = arith.constant -2.72614237E-10 : f32
    %30 = vector.broadcast %cst_15 : f32 to vector<64x128xf32>
    %31 = arith.mulf %30, %29 : vector<64x128xf32>
    %cst_16 = arith.constant 2.77068146E-8 : f32
    %32 = vector.broadcast %cst_16 : f32 to vector<64x128xf32>
    %33 = arith.addf %31, %32 : vector<64x128xf32>
    %34 = arith.mulf %33, %29 : vector<64x128xf32>
    %cst_17 = arith.constant -2.10102394E-6 : f32
    %35 = vector.broadcast %cst_17 : f32 to vector<64x128xf32>
    %36 = arith.addf %34, %35 : vector<64x128xf32>
    %37 = arith.mulf %36, %29 : vector<64x128xf32>
    %cst_18 = arith.constant -5.69250624E-5 : f32
    %38 = vector.broadcast %cst_18 : f32 to vector<64x128xf32>
    %39 = arith.addf %37, %38 : vector<64x128xf32>
    %40 = arith.mulf %39, %29 : vector<64x128xf32>
    %cst_19 = arith.constant -7.34990637E-4 : f32
    %41 = vector.broadcast %cst_19 : f32 to vector<64x128xf32>
    %42 = arith.addf %40, %41 : vector<64x128xf32>
    %43 = arith.mulf %42, %29 : vector<64x128xf32>
    %cst_20 = arith.constant -2.954600e-03 : f32
    %44 = vector.broadcast %cst_20 : f32 to vector<64x128xf32>
    %45 = arith.addf %43, %44 : vector<64x128xf32>
    %46 = arith.mulf %45, %29 : vector<64x128xf32>
    %cst_21 = arith.constant -0.0160960332 : f32
    %47 = vector.broadcast %cst_21 : f32 to vector<64x128xf32>
    %48 = arith.addf %46, %47 : vector<64x128xf32>
    %49 = arith.mulf %48, %28 : vector<64x128xf32>
    %cst_22 = arith.constant -1.45660715E-5 : f32
    %50 = vector.broadcast %cst_22 : f32 to vector<64x128xf32>
    %51 = arith.mulf %50, %29 : vector<64x128xf32>
    %cst_23 = arith.constant -2.13374049E-4 : f32
    %52 = vector.broadcast %cst_23 : f32 to vector<64x128xf32>
    %53 = arith.addf %51, %52 : vector<64x128xf32>
    %54 = arith.mulf %53, %29 : vector<64x128xf32>
    %cst_24 = arith.constant -0.00168282702 : f32
    %55 = vector.broadcast %cst_24 : f32 to vector<64x128xf32>
    %56 = arith.addf %54, %55 : vector<64x128xf32>
    %57 = arith.mulf %56, %29 : vector<64x128xf32>
    %cst_25 = arith.constant -0.00737332925 : f32
    %58 = vector.broadcast %cst_25 : f32 to vector<64x128xf32>
    %59 = arith.addf %57, %58 : vector<64x128xf32>
    %60 = arith.mulf %59, %29 : vector<64x128xf32>
    %cst_26 = arith.constant -0.0142647391 : f32
    %61 = vector.broadcast %cst_26 : f32 to vector<64x128xf32>
    %62 = arith.addf %60, %61 : vector<64x128xf32>
    %63 = tpu.reciprocal %62 {approx = true} : vector<64x128xf32> -> vector<64x128xf32>
    %64 = arith.mulf %62, %63 : vector<64x128xf32>
    %cst_27 = arith.constant 2.000000e+00 : f32
    %65 = vector.broadcast %cst_27 : f32 to vector<64x128xf32>
    %66 = arith.subf %65, %64 : vector<64x128xf32>
    %67 = arith.mulf %63, %66 : vector<64x128xf32>
    %68 = arith.mulf %49, %67 : vector<64x128xf32>
    %cst_28 = arith.constant 1.000000e+00 : f32
    %69 = vector.broadcast %cst_28 : f32 to vector<64x128xf32>
    %70 = arith.addf %69, %68 : vector<64x128xf32>
    %71 = arith.mulf %22, %70 : vector<64x128xf32>
    %c0_29 = arith.constant 0 : index
    %c0_30 = arith.constant 0 : index
    %72 = vector.load %arg5[%c0_29, %c0_30] : memref<128x128xf32, #tpu.memory_space<vmem>>, vector<128x128xf32>
    %cst_31 = arith.constant dense<0.000000e+00> : vector<64x128xf32>
    %73 = tpu.matmul %71, %72, %cst_31 {dimension_numbers = #tpu.dot_dimension_numbers<[1], [0], [0], [1], [0, 0, 1, 1], [], []>} : vector<64x128xf32>, vector<128x128xf32>, vector<64x128xf32> -> vector<64x128xf32>
    %c4 = arith.constant 4 : index
    %c0_32 = arith.constant 0 : index
    %74 = vector.load %arg2[%c4, %c0_32] : memref<8x128xf32, #tpu.memory_space<vmem>>, vector<1x128xf32>
    %75 = vector.broadcast %74 : vector<1x128xf32> to vector<64x128xf32>
    %76 = arith.addf %73, %75 : vector<64x128xf32>
    %77 = arith.addf %15, %76 : vector<64x128xf32>
    %c0_33 = arith.constant 0 : index
    %c0_34 = arith.constant 0 : index
    %78 = vector.load %arg6[%c0_33, %c0_34] : memref<128x128xf32, #tpu.memory_space<vmem>>, vector<128x128xf32>
    %cst_35 = arith.constant dense<0.000000e+00> : vector<64x128xf32>
    %79 = tpu.matmul %77, %78, %cst_35 {dimension_numbers = #tpu.dot_dimension_numbers<[1], [0], [0], [1], [0, 0, 1, 1], [], []>} : vector<64x128xf32>, vector<128x128xf32>, vector<64x128xf32> -> vector<64x128xf32>
    %c5 = arith.constant 5 : index
    %c0_36 = arith.constant 0 : index
    %80 = vector.load %arg2[%c5, %c0_36] : memref<8x128xf32, #tpu.memory_space<vmem>>, vector<1x128xf32>
    %81 = vector.broadcast %80 : vector<1x128xf32> to vector<64x128xf32>
    %82 = arith.addf %79, %81 : vector<64x128xf32>
    %c0_37 = arith.constant 0 : index
    %c0_38 = arith.constant 0 : index
    %83 = vector.load %arg7[%c0_37, %c0_38] : memref<64x128xf32, #tpu.memory_space<vmem>>, vector<64x128xf32>
    tpu.vector_store %arg7[%c0_37, %c0_38], %82 {strides = array<i32>} : memref<64x128xf32, #tpu.memory_space<vmem>>, vector<64x128xf32>,
    return
  }
  func.func @transform_0(%arg0: i32) -> (i32, i32) {
    %c0_i32 = arith.constant 0 : i32
    %c0_i32_0 = arith.constant 0 : i32
    return %arg0, %c0_i32 : i32, i32
  }
  func.func @transform_1(%arg0: i32) -> (i32, i32) {
    %c0_i32 = arith.constant 0 : i32
    %c0_i32_0 = arith.constant 0 : i32
    %c0_i32_1 = arith.constant 0 : i32
    return %c0_i32, %c0_i32_0 : i32, i32
  }
  func.func @transform_2(%arg0: i32) -> (i32, i32) {
    %c0_i32 = arith.constant 0 : i32
    %c0_i32_0 = arith.constant 0 : i32
    %c0_i32_1 = arith.constant 0 : i32
    return %c0_i32, %c0_i32_0 : i32, i32
  }
  func.func @transform_3(%arg0: i32) -> (i32, i32) {
    %c0_i32 = arith.constant 0 : i32
    %c0_i32_0 = arith.constant 0 : i32
    %c0_i32_1 = arith.constant 0 : i32
    return %c0_i32, %c0_i32_0 : i32, i32
  }
  func.func @transform_4(%arg0: i32) -> (i32, i32) {
    %c0_i32 = arith.constant 0 : i32
    %c0_i32_0 = arith.constant 0 : i32
    %c0_i32_1 = arith.constant 0 : i32
    return %c0_i32, %c0_i32_0 : i32, i32
  }
  func.func @transform_5(%arg0: i32) -> (i32, i32) {
    %c0_i32 = arith.constant 0 : i32
    %c0_i32_0 = arith.constant 0 : i32
    %c0_i32_1 = arith.constant 0 : i32
    return %c0_i32, %c0_i32_0 : i32, i32
  }
  func.func @transform_6(%arg0: i32) -> (i32, i32) {
    %c0_i32 = arith.constant 0 : i32
    %c0_i32_0 = arith.constant 0 : i32
    return %arg0, %c0_i32 : i32, i32
  }
}

</mosaic_0001>

<bundles_post_ra>
// kernel: apply.1
= control target key start
LH: loop header
LB: loop body
LE: loop exit
PB: predicated region body
PF: predicated region fallthrough
CT: control target
= control target key end

     0   :  { %11 = vsyncpa [#allocation3], 0  ;;  %s3758_s0 = inlined_call_operand.vmem [shape: f32[64,128], index: 0, kind: input, shape index: {}]   ;;  %s3759_s1 = inlined_call_operand.vmem [shape: f32[8,128], index: 1, kind: input, shape index: {}]   ;;  %s3760_s2 = inlined_call_operand.hbm [shape: f32[128,128], index: 2, kind: input, shape index: {}]   ;;  %s3761_s3 = inlined_call_operand.hbm [shape: f32[128,128], index: 3, kind: input, shape index: {}]   ;;  %s3762_s4 = inlined_call_operand.vmem [shape: f32[128,128], index: 4, kind: input, shape index: {}]   ;;  %s3763_s5 = inlined_call_operand.vmem [shape: f32[128,128], index: 5, kind: input, shape index: {}]   ;;  %s3764_s6 = inlined_call_operand.vmem [shape: f32[64,128], index: 6, kind: output, shape index: {}]  }
   0x1   :  { %s21_s23 = sshll.u32 %s3760_s2, 4  ;;  %s22_s23 = int_to_ptr.hbm [resolvable:$true] %s21_s23 }
   0x2   :  { %12 = vsyncpa [#allocation5], 0  ;;  %s2015_s24 = smov [#allocation2]   ;;  %s34_s28 = sshll.u32 %s3761_s3, 4  ;;  %s35_s28 = int_to_ptr.hbm [resolvable:$true] %s34_s28 }
   0x3   :  { %s23_s25 = sshll.u32 %s2015_s24, 4  ;;  %s2016_s29 = smov 128   ;;  %s24_s25 = int_to_ptr.vmem [resolvable:$true] %s23_s25 }
   0x4   :  { %s2017_s30 = smov 8   ;;  %s2018_s7 = smov [#allocation4]  }
   0x5   :  { %29 = dma.hbm_to_vmem [thread:$0]  %s22_s23, 2048, %s24_s25, [#allocation3], %s2016_s29, %s2016_s29, %s2017_s30  }
   0x6   :  { %s36_s8 = sshll.u32 %s2018_s7, 4  ;;  %s37_s8 = int_to_ptr.vmem [resolvable:$true] %s36_s8 }
   0x7   :  { %42 = dma.hbm_to_vmem [thread:$0]  %s35_s28, 2048, %s37_s8, [#allocation5], %s2016_s29, %s2016_s29, %s2017_s30  }
   0x8   :  { %2011 = dma.done.wait [#allocation3], 2048  }
   0x9   :  { %2012 = vsyncadd [#allocation3], 4294965248 }
   0xa   :  { %2013 = dma.done.wait [#allocation5], 2048  }
   0xb   :  { %2014 = vsyncadd [#allocation5], 4294965248  ;;  %v2019_v0 = vmov 32   ;;  %v59_v1 = vld [vmem:[%s3758_s0 + $0x20] sm:$0xff]  ;;  %v57_v2 = vld [vmem:[%s3758_s0 + $0x10] sm:$0xff] }
   0xc   :  { %1939 = vset.pattern.permute.xlu2 %v2019_v0  ;;  %1938 = vset.pattern.permute.xlu1 %v2019_v0  ;;  %v55_v3 = vld [vmem:[%s3758_s0] sm:$0xff]  ;;  %v1378_v4 = vld [vmem:[#allocation2 + $0x78] sm:$0xff]  ;;  %v1377_v5 = vld [vmem:[#allocation2 + $0x70] sm:$0xff] }
   0xd   :  { %1937 = vset.pattern.permute.xlu0 %v2019_v0  ;;  %86 = vperm.xlu2 %1939, %v59_v1   ;;  %v1376_v6 = vld [vmem:[#allocation2 + $0x68] sm:$0xff]  ;;  %v1375_v7 = vld [vmem:[#allocation2 + $0x60] sm:$0xff]  ;;  %v58_v9 = vld [vmem:[%s3758_s0 + $0x18] sm:$0xff] }
   0xe   :  { %76 = vperm.xlu1 %1938, %v57_v2   ;;  %66 = vperm.xlu0 %1937, %v55_v3   ;;  %v60_v8 = vld [vmem:[%s3758_s0 + $0x28] sm:$0xff]  ;;  %v1374_v11 = vld [vmem:[#allocation2 + $0x58] sm:$0xff]  ;;  %v1373_v12 = vld [vmem:[#allocation2 + $0x50] sm:$0xff] }
   0xf   :  { %1389 = vmatpush.msra.mxu0 %v1378_v4  ;;  %v56_v10 = vld [vmem:[%s3758_s0 + $0x8] sm:$0xff]  ;;  %v1371_v14 = vld [vmem:[#allocation2 + $0x40] sm:$0xff]  ;;  %v62_v15 = vld [vmem:[%s3758_s0 + $0x38] sm:$0xff] }
  0x10   :  { %v1372_v13 = vld [vmem:[#allocation2 + $0x48] sm:$0xff]  ;;  %v61_v16 = vld [vmem:[%s3758_s0 + $0x30] sm:$0xff]  ;;  %v1370_v17 = vld [vmem:[#allocation2 + $0x38] sm:$0xff] }
  0x11   :  { %1390 = vmatpush.msra.mxu0 %v1377_v5  ;;  %v1369_v18 = vld [vmem:[#allocation2 + $0x30] sm:$0xff]  ;;  %v1368_v19 = vld [vmem:[#allocation2 + $0x28] sm:$0xff]  ;;  %v1367_v20 = vld [vmem:[#allocation2 + $0x20] sm:$0xff]  ;;  %v3768_v5 = vmov 920167782  }
  0x12   :  { %v1366_v21 = vld [vmem:[#allocation2 + $0x18] sm:$0xff]  ;;  %v1365_v22 = vld [vmem:[#allocation2 + $0x10] sm:$0xff]  ;;  %v1364_v23 = vld [vmem:[#allocation2 + $0x8] sm:$0xff] }
  0x13   :  { %1391 = vmatpush.msra.mxu0 %v1376_v6  ;;  %v1363_v24 = vld [vmem:[#allocation2] sm:$0xff] }
  0x14   :  { %v2095_v25 = vld [vmem:[%s3759_s1] ss:$0 sm:$0xff]  ;;  %v2100_v27 = vld [vmem:[%s3759_s1 + $0x1] ss:$0 sm:$0xff] }
  0x15   :  { %1392 = vmatpush.msra.mxu0 %v1375_v7  ;;  %91 = vperm.xlu2 %1939, %v60_v8  }
  0x16   :  { %81 = vperm.xlu1 %1938, %v58_v9   ;;  %71 = vperm.xlu0 %1937, %v56_v10  }
  0x17   :  { %1393 = vmatpush.msra.mxu0 %v1374_v11 }
  0x19   :  { %1394 = vmatpush.msra.mxu0 %v1373_v12 }
  0x1b   :  { %1395 = vmatpush.msra.mxu0 %v1372_v13  ;;  %v3766_v13 = vmov 1326507024  }
  0x1d   :  { %1396 = vmatpush.msra.mxu0 %v1371_v14 }
  0x1e   :  { %101 = vperm.xlu1 %1938, %v62_v15   ;;  %96 = vperm.xlu0 %1937, %v61_v16  }
  0x1f   :  { %1397 = vmatpush.msra.mxu0 %v1370_v17 }
  0x21   :  { %1398 = vmatpush.msra.mxu0 %v1369_v18 }
  0x23   :  { %1399 = vmatpush.msra.mxu0 %v1368_v19 }
  0x25   :  { %1400 = vmatpush.msra.mxu0 %v1367_v20 }
  0x27   :  { %1401 = vmatpush.msra.mxu0 %v1366_v21 }
  0x29   :  { %1402 = vmatpush.msra.mxu0 %v1365_v22 }
  0x2b   :  { %1403 = vmatpush.msra.mxu0 %v1364_v23 }
  0x2d   :  { %1404 = vmatpush.msra.mxu0 %v1363_v24 }
  0x2e   :  { %1405 = vmatmul.f32.vlgmr.msra.gmra.mxu0 %v55_v3  ;;  %v3770_v3 = vmov 2102212464  }
  0x36   :  { %1408 = vmatmul.f32.gmra.mxu0 %v56_v10 }
  0x3e   :  { %1411 = vmatmul.f32.gmra.mxu0 %v57_v2 }
  0x46   :  { %1414 = vmatmul.f32.gmra.mxu0 %v58_v9 }
  0x4e   :  { %1417 = vmatmul.f32.gmra.mxu0 %v59_v1 }
  0x56   :  { %1420 = vmatmul.f32.gmra.mxu0 %v60_v8 }
  0x5e   :  { %1423 = vmatmul.f32.gmra.mxu0 %v61_v16 }
  0x66   :  { %1426 = vmatmul.f32.gmra.mxu0 %v62_v15 }
  0x67   :  { %v87_v26 = vpop.permute.xlu2 %86 }
  0x68   :  { %v109_v28 = vmul.f32 %v2095_v25, %v87_v26 }
  0x6a   :  { %v2104_v29 = vadd.f32 %v2100_v27, %v109_v28 }
  0x6c   :  { %3807 = vst [vmem:[#allocation8_spill] sm:$0xff] %v2104_v29  ;;  %v746_v30 = vand.u32 2139095040, %v2104_v29 }
  0x6e   :  { %v747_v32 = vshrl.u32 %v746_v30, 23 }
  0x6f   :  { %v92_v31 = vpop.permute.xlu2 %91 }
  0x70   :  { %v110_v33 = vmul.f32 %v2095_v25, %v92_v31  ;;  %v1905_v34 = vadd.s32 4294967169, %v747_v32 }
  0x72   :  { %v2109_v35 = vadd.f32 %v2100_v27, %v110_v33  ;;  %v753_v39 = vadd.s32 1, %v1905_v34 }
  0x74   :  { %3808 = vst [vmem:[#allocation9_spill] sm:$0xff] %v2109_v35  ;;  %v901_v40 = vand.u32 2139095040, %v2109_v35  ;;  %vm754_vm0 = vcmp.gt.s32.totalorder %v753_v39, 0 }
  0x75   :  { %v755_v49 = vsel %vm754_vm0, %v753_v39, 0 }
  0x76   :  { %v902_v44 = vshrl.u32 %v901_v40, 23  ;;  %v2125_v55 = vand.u32 31, %v755_v49  ;;  %v2140_v9 = vshrl.u32 %v755_v49, 5 }
  0x78   :  { %v1908_v52 = vadd.s32 4294967169, %v902_v44  ;;  %3809 = vst [vmem:[#allocation10_spill] sm:$0xff] %v2125_v55  ;;  %v2130_v61 = vsub.s32 32, %v2125_v55  ;;  %v769_v4 = vshll.u32 %v3770_v3, %v2125_v55  ;;  %v2144_v12 = vshll.u32 %v3768_v5, %v2125_v55 }
  0x79   :  { %vm778_vm4 = vcmp.lt.s32.totalorder %v2140_v9, 4 }
  0x7a   :  { %v908_v58 = vadd.s32 1, %v1908_v52  ;;  %3810 = vst [vmem:[#allocation11_spill] sm:$0xff] %v2130_v61  ;;  %v770_v6 = vshrl.u32 %v3768_v5, %v2130_v61  ;;  %v2148_v14 = vshrl.u32 %v3766_v13, %v2130_v61  ;;  %v3776_v52 = vmov 683565275  }
  0x7b   :  { %v3822_v61 = vmov 2475754826  }
  0x7c   :  { %vm909_vm2 = vcmp.gt.s32.totalorder %v908_v58, 0  ;;  %v2154_v18 = vor.u32 %v770_v6, %v769_v4 }
  0x7d   :  { %v910_v10 = vsel %vm909_vm2, %v908_v58, 0 }
  0x7e   :  { %3812 = vst [vmem:[#allocation13_spill] sm:$0xff] %v2154_v18  ;;  %v2156_v19 = vand.u32 31, %v910_v10  ;;  %v2172_v31 = vsel %vm778_vm4, %v2154_v18, 920167782  ;;  %v2174_v32 = vshrl.u32 %v910_v10, 5  ;;  %v3789_v18 = vmov 0  }
  0x7f   :  { %3814 = vst [vmem:[#allocation15_spill] sm:$0xff] %v2172_v31 }
  0x80   :  { %v77_v36 = vpop.permute.xlu1 %76  ;;  %v67_v37 = vpop.permute.xlu0 %66  ;;  %3813 = vst [vmem:[#allocation14_spill] sm:$0xff] %v2156_v19  ;;  %v2177_v33 = vsub.s32 32, %v2156_v19  ;;  %v2220_v10 = vshll.u32 %v3768_v5, %v2156_v19 }
  0x81   :  { %v105_v38 = vmul.f32 %v2095_v25, %v67_v37  ;;  %v107_v42 = vmul.f32 %v2095_v25, %v77_v36  ;;  %v2183_v36 = vshll.u32 %v3770_v3, %v2156_v19 }
  0x82   :  { %3815 = vst [vmem:[#allocation16_spill] sm:$0xff] %v2177_v33 }
  0x83   :  { %v2114_v41 = vadd.f32 %v2100_v27, %v105_v38  ;;  %v2120_v50 = vadd.f32 %v2100_v27, %v107_v42 }
  0x85   :  { %v126_v43 = vand.u32 2139095040, %v2114_v41  ;;  %v436_v57 = vand.u32 2139095040, %v2120_v50  ;;  %v3765_v15 = vand.u32 2147483647, %v2114_v41 }
  0x87   :  { %v127_v46 = vshrl.u32 %v126_v43, 23  ;;  %v437_v0 = vshrl.u32 %v436_v57, 23  ;;  %v130_v23 = vand.u32 8388607, %v3765_v15  ;;  %v3774_v43 = vmov 2475754826  }
  0x88   :  { %v82_v45 = vpop.permute.xlu1 %81  ;;  %v72_v47 = vpop.permute.xlu0 %71  ;;  %v3772_v57 = vmov 2131351028  }
  0x89   :  { %v106_v48 = vmul.f32 %v2095_v25, %v72_v47  ;;  %v1893_v51 = vadd.s32 4294967169, %v127_v46  ;;  %v1899_v11 = vadd.s32 4294967169, %v437_v0  ;;  %v108_v17 = vmul.f32 %v2095_v25, %v82_v45 }
  0x8b   :  { %v2123_v53 = vadd.f32 %v2100_v27, %v106_v48  ;;  %v133_v54 = vadd.s32 1, %v1893_v51  ;;  %v443_v21 = vadd.s32 1, %v1899_v11  ;;  %v2167_v26 = vadd.f32 %v2100_v27, %v108_v17 }
  0x8c   :  { %v131_v48 = vor.u32 8388608, %v130_v23  ;;  %v2224_v11 = vshrl.u32 %v3766_v13, %v2177_v33 }
  0x8d   :  { %v281_v56 = vand.u32 2139095040, %v2123_v53  ;;  %vm134_vm1 = vcmp.gt.s32.totalorder %v133_v54, 0  ;;  %vm444_vm5 = vcmp.gt.s32.totalorder %v443_v21, 0  ;;  %v591_v46 = vand.u32 2139095040, %v2167_v26 }
  0x8e   :  { %v135_v62 = vsel %vm134_vm1, %v133_v54, 0  ;;  %v2194_v49 = vsel %vm444_vm5, %v443_v21, 0  ;;  %v2226_v17 = vshll.u32 %v131_v48, 8 }
  0x8f   :  { %v282_v59 = vshrl.u32 %v281_v56, 23  ;;  %v137_v2 = vand.u32 31, %v135_v62  ;;  %v2186_v39 = vshrl.u32 %v135_v62, 5  ;;  %v2236_v23 = vand.u32 31, %v2194_v49 }
  0x90   :  { %v102_v60 = vpop.permute.xlu1 %101 }
  0x91   :  { %v1896_v63 = vadd.s32 4294967169, %v282_v59  ;;  %v112_v1 = vmul.f32 %v2095_v25, %v102_v60  ;;  %v2151_v16 = vsub.s32 32, %v137_v2  ;;  %v149_v37 = vshll.u32 %v3770_v3, %v137_v2 }
  0x92   :  { %v152_v40 = vshll.u32 %v3768_v5, %v137_v2  ;;  %v140_v54 = vshll.u32 %v3776_v52, %v137_v2  ;;  %v143_v56 = vshll.u32 %v3774_v43, %v137_v2  ;;  %v146_v59 = vshll.u32 %v3772_v57, %v137_v2 }
  0x93   :  { %v288_v7 = vadd.s32 1, %v1896_v63  ;;  %v2138_v8 = vadd.f32 %v2100_v27, %v112_v1  ;;  %v150_v24 = vshrl.u32 %v3768_v5, %v2151_v16  ;;  %v153_v34 = vshrl.u32 %v3766_v13, %v2151_v16 }
  0x94   :  { %v141_v44 = vshrl.u32 %v3774_v43, %v2151_v16  ;;  %v144_v58 = vshrl.u32 %v3772_v57, %v2151_v16  ;;  %v147_v60 = vshrl.u32 %v3770_v3, %v2151_v16  ;;  %vm158_vm7 = vcmp.lt.s32.totalorder %v2186_v39, 4 }
  0x95   :  { %3811 = vst [vmem:[#allocation12_spill] sm:$0xff] %v2138_v8  ;;  %vm289_vm3 = vcmp.gt.s32.totalorder %v288_v7, 0  ;;  %v1211_v20 = vand.u32 2139095040, %v2138_v8  ;;  %v151_v45 = vor.u32 %v150_v24, %v149_v37  ;;  %v154_v51 = vor.u32 %v153_v34, %v152_v40 }
  0x96   :  { %v290_v28 = vsel %vm289_vm3, %v288_v7, 0  ;;  %v142_v0 = vor.u32 %v141_v44, %v140_v54  ;;  %v145_v6 = vor.u32 %v144_v58, %v143_v56  ;;  %v148_v7 = vor.u32 %v147_v60, %v146_v59 }
  0x97   :  { %v1212_v30 = vshrl.u32 %v1211_v20, 23  ;;  %v2189_v42 = vand.u32 31, %v290_v28  ;;  %v164_v1 = vsel %vm158_vm7, %v151_v45, 920167782  ;;  %v2216_v2 = vshrl.u32 %v3768_v5, %v2177_v33 }
  0x98   :  { %v168_v20 = vsel %vm158_vm7, %v154_v51, 1326507024  ;;  %vm155_vm8 = vcmp.lt.s32.totalorder %v2186_v39, 1  ;;  %vm157_vm9 = vcmp.lt.s32.totalorder %v2186_v39, 3  ;;  %v592_v37 = vshrl.u32 %v591_v46, 23 }
  0x99   :  { %v1914_v38 = vadd.s32 4294967169, %v1212_v30  ;;  %v2205_v62 = vsub.s32 32, %v2189_v42  ;;  %v163_v30 = vsel %vm155_vm8, %v142_v0, %v145_v6  ;;  %v165_v34 = vsel %vm157_vm9, %v148_v7, %v164_v1 }
  0x9a   :  { %vm156_vm10 = vcmp.lt.s32.totalorder %v2186_v39, 2  ;;  %v167_v48 = vsel %vm155_vm8, %v145_v6, %v148_v7  ;;  %v169_v46 = vsel %vm157_vm9, %v151_v45, %v168_v20  ;;  %v2261_v51 = vshrl.u32 %v290_v28, 5 }
  0x9b   :  { %v1218_v47 = vadd.s32 1, %v1914_v38  ;;  %v305_v24 = vshrl.u32 %v3768_v5, %v2205_v62  ;;  %v308_v38 = vshrl.u32 %v3766_v13, %v2205_v62  ;;  %v307_v54 = vshll.u32 %v3768_v5, %v2189_v42 }
  0x9c   :  { %v166_v58 = vsel %vm156_vm10, %v163_v30, %v165_v34  ;;  %v170_v60 = vsel %vm156_vm10, %v167_v48, %v169_v46  ;;  %v172_v1 = vand.u32 65535, %v2226_v17  ;;  %v173_v45 = vshrl.u32 %v2226_v17, 16 }
  0x9d   :  { %vm1219_vm6 = vcmp.gt.s32.totalorder %v1218_v47, 0  ;;  %v2276_v28 = vsub.s32 32, %v2236_v23  ;;  %v2280_v20 = vshll.u32 %v3770_v3, %v2236_v23  ;;  %v309_v56 = vor.u32 %v308_v38, %v307_v54 }
  0x9e   :  { %v2207_v63 = vsel %vm1219_vm6, %v1218_v47, 0  ;;  %v304_v47 = vshll.u32 %v3770_v3, %v2189_v42  ;;  %v160_v30 = vsel %vm158_vm7, %v148_v7, 2102212464  ;;  %v175_v34 = vshrl.u32 %v170_v60, 16 }
  0x9f   :  { %v2212_v4 = vand.u32 31, %v2207_v63  ;;  %v197_v15 = vshrl.u32 %v166_v58, 16  ;;  %v2286_v48 = vshll.u32 %v3768_v5, %v2236_v23  ;;  %v2288_v46 = vadd.s32 4294967169, %v592_v37 }
  0xa0   :  { %v2269_v59 = vor.u32 %v305_v24, %v304_v47  ;;  %v174_v24 = vand.u32 65535, %v170_v60  ;;  %v196_v47 = vand.u32 65535, %v166_v58  ;;  %vm313_vm11 = vcmp.lt.s32.totalorder %v2261_v51, 4 }
  0xa1   :  { %3816 = vst [vmem:[#allocation17_spill] sm:$0xff] %v2212_v4  ;;  %v2231_v21 = vsub.s32 32, %v2212_v4  ;;  %v2248_v40 = vshll.u32 %v3768_v5, %v2212_v4  ;;  %v139_v22 = vshrl.u32 %v3776_v52, %v2151_v16  ;;  %v177_v7 = vmul.u32 %v175_v34, %v172_v1 }
  0xa2   :  { %v2296_v38 = vsel %vm313_vm11, %v2269_v59, 920167782  ;;  %v178_v54 = vmul.u32 %v174_v24, %v173_v45  ;;  %v323_v60 = vsel %vm313_vm11, %v309_v56, 1326507024  ;;  %v199_v5 = vmul.u32 %v197_v15, %v172_v1 }
  0xa3   :  { %3817 = vst [vmem:[#allocation18_spill] sm:$0xff] %v2231_v21  ;;  %v2252_v44 = vshrl.u32 %v3766_v13, %v2231_v21  ;;  %v159_v37 = vsel %vm155_vm8, %v139_v22, %v142_v0  ;;  %v161_v13 = vsel %vm157_vm9, %v145_v6, %v160_v30  ;;  %v176_v16 = vmul.u32 %v174_v24, %v172_v1 }
  0xa4   :  { %3818 = vst [vmem:[#allocation19_spill] sm:$0xff] %v2248_v40  ;;  %v179_v3 = vmul.u32 %v175_v34, %v173_v45  ;;  %v180_v57 = vshll.u32 %v177_v7, 16  ;;  %v198_v43 = vmul.u32 %v196_v47, %v172_v1  ;;  %v181_v52 = vshrl.u32 %v177_v7, 16 }
  0xa5   :  { %3819 = vst [vmem:[#allocation20_spill] sm:$0xff] %v2252_v44  ;;  %v182_v8 = vshll.u32 %v178_v54, 16  ;;  %v200_v33 = vmul.u32 %v196_v47, %v173_v45  ;;  %v202_v19 = vshll.u32 %v199_v5, 16  ;;  %v183_v35 = vshrl.u32 %v178_v54, 16 }
  0xa6   :  { %vm184_vm12 = vc.u32 %v176_v16, %v180_v57  ;;  %v186_v58 = vadd.s32 %v180_v57, %v176_v16  ;;  %v3820_v56 = vand.u32 2147483647, %v2123_v53  ;;  %v201_v0 = vmul.u32 %v197_v15, %v173_v45 }
  0xa7   :  { %v185_v22 = vsel %vm184_vm12, 1, %v3789_v18  ;;  %v204_v6 = vshll.u32 %v200_v33, 16  ;;  %vm206_vm13 = vc.u32 %v198_v43, %v202_v19  ;;  %v208_v24 = vadd.s32 %v202_v19, %v198_v43 }
  0xa8   :  { %v285_v31 = vand.u32 8388607, %v3820_v56  ;;  %v187_v30 = vadd.s32 %v185_v22, %v179_v3  ;;  %vm188_vm14 = vc.u32 %v186_v58, %v182_v8  ;;  %v207_v1 = vsel %vm206_vm13, 1, %v3789_v18 }
  0xa9   :  { %v189_v34 = vsel %vm188_vm14, 1, %v3789_v18  ;;  %v203_v47 = vshrl.u32 %v199_v5, 16  ;;  %v209_v7 = vadd.s32 %v207_v1, %v201_v0  ;;  %vm210_vm15 = vc.u32 %v208_v24, %v204_v6 }
  0xaa   :  { %v286_v54 = vor.u32 8388608, %v285_v31  ;;  %v191_v57 = vadd.s32 %v189_v34, %v187_v30  ;;  %v3821_v16 = vmov 683565275   ;;  %v296_v15 = vshrl.u32 %v3822_v61, %v2205_v62 }
  0xab   :  { %v295_v56 = vshll.u32 %v3821_v16, %v2189_v42  ;;  %v211_v45 = vsel %vm210_vm15, 1, %v3789_v18  ;;  %v298_v3 = vshll.u32 %v3822_v61, %v2189_v42  ;;  %v3823_v8 = vmov 2131351028  }
  0xac   :  { %v299_v19 = vshrl.u32 %v3823_v8, %v2205_v62  ;;  %v301_v5 = vshll.u32 %v3823_v8, %v2189_v42  ;;  %v192_v31 = vadd.s32 %v191_v57, %v181_v52  ;;  %v213_v43 = vadd.s32 %v211_v45, %v209_v7  ;;  %v97_v57 = vpop.permute.xlu0 %96 }
  0xad   :  { %v2321_v58 = vor.u32 %v296_v15, %v295_v56  ;;  %v3824_v22 = vmov 2102212464   ;;  %v162_v30 = vsel %vm156_vm10, %v159_v37, %v161_v13  ;;  %v205_v1 = vshrl.u32 %v200_v33, 16 }
  0xae   :  { %v302_v0 = vshrl.u32 %v3824_v22, %v2205_v62  ;;  %v2327_v34 = vor.u32 %v299_v19, %v298_v3  ;;  %vm310_vm0 = vcmp.lt.s32.totalorder %v2261_v51, 1  ;;  %v2330_v18 = vadd.s32 %v192_v31, %v183_v35 }
  0xaf   :  { %v214_v55 = vadd.s32 %v213_v43, %v203_v47  ;;  %vm312_vm1 = vcmp.lt.s32.totalorder %v2261_v51, 3  ;;  %v2333_v42 = vadd.s32 %v208_v24, %v204_v6  ;;  %v2342_v33 = vshll.u32 %v286_v54, 8 }
  0xb0   :  { %v303_v29 = vor.u32 %v302_v0, %v301_v5  ;;  %v318_v52 = vsel %vm310_vm0, %v2321_v58, %v2327_v34  ;;  %v324_v13 = vsel %vm312_vm1, %v2269_v59, %v323_v60  ;;  %v3825_v35 = vmov 920167782  }
  0xb1   :  { %v460_v39 = vshrl.u32 %v3825_v35, %v2276_v28  ;;  %v3826_v37 = vmov 1326507024   ;;  %v215_v6 = vadd.s32 %v214_v55, %v205_v1  ;;  %v216_v24 = vmul.u32 %v2226_v17, %v162_v30 }
  0xb2   :  { %v2348_v47 = vshrl.u32 %v3826_v37, %v2276_v28  ;;  %vm218_vm2 = vc.u32 %v2330_v18, %v2333_v42  ;;  %vm311_vm3 = vcmp.lt.s32.totalorder %v2261_v51, 2  ;;  %v320_v59 = vsel %vm312_vm1, %v303_v29, %v2296_v38 }
  0xb3   :  { %v322_v60 = vsel %vm310_vm0, %v2327_v34, %v303_v29  ;;  %v219_v7 = vadd.s32 1, %v215_v6  ;;  %v321_v54 = vsel %vm311_vm3, %v318_v52, %v320_v59  ;;  %v327_v17 = vand.u32 65535, %v2342_v33 }
  0xb4   :  { %v325_v55 = vsel %vm311_vm3, %v322_v60, %v324_v13  ;;  %v328_v56 = vshrl.u32 %v2342_v33, 16  ;;  %v351_v3 = vand.u32 65535, %v321_v54  ;;  %v2367_v38 = vshrl.u32 %v2194_v49, 5 }
  0xb5   :  { %v329_v15 = vand.u32 65535, %v325_v55  ;;  %v330_v45 = vshrl.u32 %v325_v55, 16  ;;  %v2370_v19 = vadd.s32 1, %v2288_v46  ;;  %v220_v5 = vsel %vm218_vm2, %v219_v7, %v215_v6 }
  0xb6   :  { %v352_v31 = vshrl.u32 %v321_v54, 16  ;;  %v2374_v43 = vor.u32 %v2216_v2, %v2183_v36  ;;  %v221_v0 = vadd.s32 %v220_v5, %v216_v24  ;;  %v2377_v52 = vor.u32 %v460_v39, %v2280_v20 }
  0xb7   :  { %v332_v30 = vmul.u32 %v330_v45, %v327_v17  ;;  %v333_v1 = vmul.u32 %v329_v15, %v328_v56  ;;  %v111_v13 = vmul.f32 %v2095_v25, %v97_v57  ;;  %v355_v49 = vmul.u32 %v351_v3, %v328_v56 }
  0xb8   :  { %v354_v59 = vmul.u32 %v352_v31, %v327_v17  ;;  %v222_v60 = vadd.s32 536870912, %v221_v0  ;;  %v331_v6 = vmul.u32 %v329_v15, %v327_v17  ;;  %vm468_vm5 = vcmp.lt.s32.totalorder %v2367_v38, 4 }
  0xb9   :  { %v335_v7 = vshll.u32 %v332_v30, 16  ;;  %vm599_vm6 = vcmp.gt.s32.totalorder %v2370_v19, 0  ;;  %v315_v36 = vsel %vm313_vm11, %v303_v29, 2102212464  ;;  %v334_v2 = vmul.u32 %v330_v45, %v328_v56 }
  0xba   :  { %v353_v20 = vmul.u32 %v351_v3, %v327_v17  ;;  %v357_v39 = vshll.u32 %v354_v59, 16  ;;  %v2386_v24 = vshrl.u32 %v222_v60, 30  ;;  %v337_v25 = vshll.u32 %v333_v1, 16 }
  0xbb   :  { %vm339_vm7 = vc.u32 %v331_v6, %v335_v7  ;;  %v341_v54 = vadd.s32 %v335_v7, %v331_v6  ;;  %v3827_v55 = vmov 0   ;;  %v359_v5 = vshll.u32 %v355_v49, 16 }
  0xbc   :  { %v340_v57 = vsel %vm339_vm7, 1, %v3827_v55  ;;  %vm361_vm8 = vc.u32 %v353_v20, %v357_v39  ;;  %v363_v15 = vadd.s32 %v357_v39, %v353_v20  ;;  %v224_v46 = vshll.u32 %v2386_v24, 30 }
  0xbd   :  { %v342_v40 = vadd.s32 %v340_v57, %v334_v2  ;;  %vm343_vm9 = vc.u32 %v341_v54, %v337_v25  ;;  %v356_v44 = vmul.u32 %v352_v31, %v328_v56  ;;  %v294_v29 = vshrl.u32 %v3821_v16, %v2205_v62 }
  0xbe   :  { %v344_v17 = vsel %vm343_vm9, 1, %v3827_v55  ;;  %v362_v45 = vsel %vm361_vm8, 1, %v3827_v55  ;;  %vm365_vm10 = vc.u32 %v363_v15, %v359_v5  ;;  %v2394_v3 = vsub.s32 %v221_v0, %v224_v46 }
  0xbf   :  { %v336_v60 = vshrl.u32 %v332_v30, 16  ;;  %v346_v6 = vadd.s32 %v344_v17, %v342_v40  ;;  %v364_v7 = vadd.s32 %v362_v45, %v356_v44  ;;  %v314_v20 = vsel %vm310_vm0, %v294_v29, %v2321_v58 }
  0xc0   :  { %v316_v56 = vsel %vm312_vm1, %v2327_v34, %v315_v36  ;;  %v366_v62 = vsel %vm365_vm10, 1, %v3827_v55  ;;  %v3797_v31 = vand.u32 2147483647, %v2120_v50  ;;  %vm933_vm11 = vcmp.lt.s32.totalorder %v2174_v32, 4 }
  0xc1   :  { %vm226_vm12 = vcmp.lt.s32.totalorder %v2394_v3, 0  ;;  %v227_v0 = vsub.s32 0, %v2394_v3  ;;  %v338_v40 = vshrl.u32 %v333_v1, 16  ;;  %v347_v44 = vadd.s32 %v346_v6, %v336_v60 }
  0xc2   :  { %v358_v30 = vshrl.u32 %v354_v59, 16  ;;  %v360_v46 = vshrl.u32 %v355_v49, 16  ;;  %v2407_v2 = vadd.s32 %v363_v15, %v359_v5  ;;  %v368_v58 = vadd.s32 %v366_v62, %v364_v7 }
  0xc3   :  { %v228_v39 = vsel %vm226_vm12, %v227_v0, %v2394_v3  ;;  %v2410_v34 = vadd.s32 %v347_v44, %v338_v40  ;;  %v450_v36 = vshll.u32 %v3821_v16, %v2236_v23  ;;  %v451_v25 = vshrl.u32 %v3822_v61, %v2276_v28 }
  0xc4   :  { %v229_v54 = vclz %v228_v39  ;;  %v369_v57 = vadd.s32 %v368_v58, %v358_v30  ;;  %v453_v1 = vshll.u32 %v3822_v61, %v2236_v23  ;;  %v454_v59 = vshrl.u32 %v3823_v8, %v2276_v28 }
  0xc5   :  { %v474_v49 = vsel %vm468_vm5, %v2377_v52, 920167782  ;;  %v600_v5 = vsel %vm599_vm6, %v2370_v19, 0  ;;  %v2427_v15 = vadd.f32 %v2100_v27, %v111_v13  ;;  %v440_v29 = vand.u32 8388607, %v3797_v31 }
  0xc6   :  { %v1894_v17 = vadd.s32 4294967294, %v229_v54  ;;  %v317_v45 = vsel %vm311_vm3, %v314_v20, %v316_v56  ;;  %v370_v60 = vadd.s32 %v369_v57, %v360_v46  ;;  %vm373_vm13 = vc.u32 %v2410_v34, %v2407_v2 }
  0xc7   :  { %v2435_v6 = vor.u32 %v451_v25, %v450_v36  ;;  %v2437_v7 = vor.u32 %v454_v59, %v453_v1  ;;  %v456_v19 = vshll.u32 %v3823_v8, %v2236_v23  ;;  %v457_v27 = vshrl.u32 %v3824_v22, %v2276_v28 }
  0xc8   :  { %vm1895_vm14 = vcmp.lt.s32.totalorder %v1894_v17, 0  ;;  %v374_v13 = vadd.s32 1, %v370_v60  ;;  %vm465_vm15 = vcmp.lt.s32.totalorder %v2367_v38, 1  ;;  %vm467_vm0 = vcmp.lt.s32.totalorder %v2367_v38, 3 }
  0xc9   :  { %v232_v51 = vsel %vm1895_vm14, 0, %v1894_v17  ;;  %v371_v20 = vmul.u32 %v2342_v33, %v317_v45  ;;  %v441_v56 = vor.u32 8388608, %v440_v29  ;;  %v2446_v62 = vor.u32 %v457_v27, %v456_v19 }
  0xca   :  { %v3828_v0 = vor.u32 %v2348_v47, %v2286_v48  ;;  %v237_v40 = vsub.s32 4294967266, %v232_v51  ;;  %v375_v44 = vsel %vm373_vm13, %v374_v13, %v370_v60  ;;  %vm466_vm1 = vcmp.lt.s32.totalorder %v2367_v38, 2 }
  0xcb   :  { %v376_v30 = vadd.s32 %v375_v44, %v371_v20  ;;  %v473_v46 = vsel %vm465_vm15, %v2435_v6, %v2437_v7  ;;  %v475_v33 = vsel %vm467_vm0, %v2446_v62, %v474_v49  ;;  %v477_v48 = vsel %vm465_vm15, %v2437_v7, %v2446_v62 }
  0xcc   :  { %v478_v23 = vsel %vm468_vm5, %v3828_v0, 1326507024  ;;  %v3829_v47 = vor.u32 %v2148_v14, %v2144_v12  ;;  %v929_v39 = vor.u32 %v2224_v11, %v2220_v10  ;;  %v2477_v36 = vsel %vm933_vm11, %v2374_v43, 920167782 }
  0xcd   :  { %v2479_v25 = vand.u32 31, %v600_v5  ;;  %v1056_v54 = vand.u32 2139095040, %v2427_v15  ;;  %v377_v57 = vadd.s32 536870912, %v376_v30  ;;  %v479_v12 = vsel %vm467_vm0, %v2377_v52, %v478_v23 }
  0xce   :  { %v2470_v58 = vsel %vm778_vm4, %v3829_v47, 1326507024  ;;  %v2485_v14 = vshll.u32 %v441_v56, 8  ;;  %v233_v1 = vsub.s32 32, %v232_v51  ;;  %v238_v59 = vadd.s32 127, %v237_v40 }
  0xcf   :  { %v476_v10 = vsel %vm466_vm1, %v473_v46, %v475_v33  ;;  %v480_v11 = vsel %vm466_vm1, %v477_v48, %v479_v12  ;;  %v2491_v49 = vshrl.u32 %v377_v57, 30  ;;  %v2497_v52 = vsel %vm933_vm11, %v929_v39, 1326507024 }
  0xd0   :  { %v482_v29 = vand.u32 65535, %v2485_v14  ;;  %v483_v17 = vshrl.u32 %v2485_v14, 16  ;;  %v484_v45 = vand.u32 65535, %v480_v11  ;;  %v2499_v60 = vshrl.u32 %v600_v5, 5 }
  0xd1   :  { %v2502_v19 = vsub.s32 32, %v2479_v25  ;;  %v485_v27 = vshrl.u32 %v480_v11, 16  ;;  %v1057_v13 = vshrl.u32 %v1056_v54, 23  ;;  %v217_v20 = vadd.s32 %v2333_v42, %v2330_v18 }
  0xd2   :  { %v379_v56 = vshll.u32 %v2491_v49, 30  ;;  %v2507_v0 = vmul.u32 %v484_v45, %v483_v17  ;;  %v239_v23 = vshll.u32 %v238_v59, 23  ;;  %v486_v40 = vmul.u32 %v484_v45, %v482_v29 }
  0xd3   :  { %v487_v44 = vmul.u32 %v485_v27, %v482_v29  ;;  %v507_v46 = vshrl.u32 %v476_v10, 16  ;;  %v614_v5 = vshll.u32 %v3824_v22, %v2479_v25  ;;  %v235_v33 = vshrl.u32 %v217_v20, %v233_v1 }
  0xd4   :  { %v2511_v48 = vsub.s32 %v376_v30, %v379_v56  ;;  %v506_v47 = vand.u32 65535, %v476_v10  ;;  %v615_v39 = vshrl.u32 %v3825_v35, %v2502_v19  ;;  %v489_v54 = vmul.u32 %v485_v27, %v483_v17 }
  0xd5   :  { %v490_v18 = vshll.u32 %v487_v44, 16  ;;  %v492_v42 = vshll.u32 %v2507_v0, 16  ;;  %v1911_v57 = vadd.s32 4294967169, %v1057_v13  ;;  %v234_v12 = vshll.u32 %v2394_v3, %v232_v51 }
  0xd6   :  { %vm381_vm2 = vcmp.lt.s32.totalorder %v2511_v48, 0  ;;  %v382_v59 = vsub.s32 0, %v2511_v48  ;;  %v240_v11 = vor.u32 4788187, %v239_v23  ;;  %v509_v30 = vmul.u32 %v507_v46, %v482_v29 }
  0xd7   :  { %vm494_vm3 = vc.u32 %v486_v40, %v490_v18  ;;  %v496_v1 = vadd.s32 %v490_v18, %v486_v40  ;;  %v236_v45 = vor.u32 %v235_v33, %v234_v12  ;;  %v510_v27 = vmul.u32 %v506_v47, %v483_v17 }
  0xd8   :  { %v383_v10 = vsel %vm381_vm2, %v382_v59, %v2511_v48  ;;  %v495_v20 = vsel %vm494_vm3, 1, %v3827_v55  ;;  %v508_v13 = vmul.u32 %v506_v47, %v482_v29  ;;  %v617_v3 = vshll.u32 %v3825_v35, %v2479_v25 }
  0xd9   :  { %v384_v56 = vclz %v383_v10  ;;  %v497_v31 = vadd.s32 %v495_v20, %v489_v54  ;;  %vm498_vm6 = vc.u32 %v496_v1, %v492_v42  ;;  %v618_v51 = vshrl.u32 %v3826_v37, %v2502_v19 }
  0xda   :  { %vm623_vm7 = vcmp.lt.s32.totalorder %v2499_v60, 4  ;;  %v1063_v23 = vadd.s32 1, %v1911_v57  ;;  %v241_v40 = vand.u32 2147483647, %v240_v11  ;;  %v499_v18 = vsel %vm498_vm6, 1, %v3827_v55 }
  0xdb   :  { %v1897_v33 = vadd.s32 4294967294, %v384_v56  ;;  %v512_v12 = vshll.u32 %v509_v30, 16  ;;  %v2527_v59 = vor.u32 %v615_v39, %v614_v5  ;;  %v501_v10 = vadd.s32 %v499_v18, %v497_v31 }
  0xdc   :  { %v511_v54 = vmul.u32 %v507_v46, %v483_v17  ;;  %v514_v42 = vshll.u32 %v510_v27, 16  ;;  %v243_v29 = vcvt.s32.f32 %v236_v45  ;;  %v491_v47 = vshrl.u32 %v487_v44, 16 }
  0xdd   :  { %vm1898_vm8 = vcmp.lt.s32.totalorder %v1897_v33, 0  ;;  %vm516_vm9 = vc.u32 %v508_v13, %v512_v12  ;;  %vm125_vm10 = vcmp.lt.s32.totalorder %v2114_v41, 0  ;;  %vm1064_vm12 = vcmp.gt.s32.totalorder %v1063_v23, 0 }
  0xde   :  { %v387_v1 = vsel %vm1898_vm8, 0, %v1897_v33  ;;  %v517_v57 = vsel %vm516_vm9, 1, %v3827_v55  ;;  %v518_v11 = vadd.s32 %v512_v12, %v508_v13  ;;  %v619_v20 = vor.u32 %v618_v51, %v617_v3 }
  0xdf   :  { %v244_v56 = vmul.f32 %v243_v29, %v241_v40  ;;  %v449_v5 = vshrl.u32 %v3821_v16, %v2276_v28  ;;  %v502_v39 = vadd.s32 %v501_v10, %v491_v47  ;;  %v392_v31 = vsub.s32 4294967266, %v387_v1 }
  0xe0   :  { %v470_v17 = vsel %vm468_vm5, %v2446_v62, 2102212464  ;;  %v519_v44 = vadd.s32 %v517_v57, %v511_v54  ;;  %vm520_vm13 = vc.u32 %v518_v11, %v514_v42  ;;  %v2537_v46 = vshrl.u32 %v2207_v63, 5 }
  0xe1   :  { %v1065_v45 = vsel %vm1064_vm12, %v1063_v23, 0  ;;  %v3831_v33 = vand.u32 2147483647, %v2114_v41  ;;  %v493_v28 = vshrl.u32 %v2507_v0, 16  ;;  %v521_v3 = vsel %vm520_vm13, 1, %v3827_v55 }
  0xe2   :  { %3830 = vst [vmem:[#allocation21_spill] sm:$0xff] %v2537_v46  ;;  %v388_v51 = vsub.s32 32, %v387_v1  ;;  %v393_v40 = vadd.s32 127, %v392_v31  ;;  %v513_v18 = vshrl.u32 %v509_v30, 16  ;;  %v523_v62 = vadd.s32 %v521_v3, %v519_v44 }
  0xe3   :  { %vm2541_vm14 = vcmp.le.f32.partialorder %v3831_v33, 0.7853982  ;;  %v245_v12 = vxor.u32 2147483648, %v244_v56  ;;  %v469_v63 = vsel %vm465_vm15, %v449_v5, %v2435_v6  ;;  %v471_v23 = vsel %vm467_vm0, %v2437_v7, %v470_v17 }
  0xe4   :  { %v2553_v10 = vadd.s32 %v502_v39, %v493_v28  ;;  %v372_v0 = vadd.s32 %v2407_v2, %v2410_v34  ;;  %v394_v54 = vshll.u32 %v393_v40, 23  ;;  %v515_v29 = vshrl.u32 %v510_v27, 16 }
  0xe5   :  { %v524_v47 = vadd.s32 %v523_v62, %v513_v18  ;;  %v2560_v30 = vsel %vm623_vm7, %v2527_v59, 920167782  ;;  %v1235_v6 = vshrl.u32 %v3825_v35, %v2231_v21  ;;  %v2564_v57 = vand.u32 31, %v1065_v45 }
  0xe6   :  { %v2566_v5 = vadd.s32 %v518_v11, %v514_v42  ;;  %v390_v7 = vshrl.u32 %v372_v0, %v388_v51  ;;  %v472_v39 = vsel %vm466_vm1, %v469_v63, %v471_v23  ;;  %v3798_v34 = vand.u32 2147483647, %v2167_v26 }
  0xe7   :  { %v525_v2 = vadd.s32 %v524_v47, %v515_v29  ;;  %v633_v27 = vsel %vm623_vm7, %v619_v20, 1326507024  ;;  %v1234_v31 = vshll.u32 %v3824_v22, %v2212_v4  ;;  %v246_v17 = vsel %vm125_vm10, %v245_v12, %v244_v56 }
  0xe8   :  { %vm528_vm5 = vc.u32 %v2553_v10, %v2566_v5  ;;  %vm1243_vm15 = vcmp.lt.s32.totalorder %v2537_v46, 4  ;;  %v389_v38 = vshll.u32 %v2511_v48, %v387_v1  ;;  %v395_v42 = vor.u32 4788187, %v394_v54 }
  0xe9   :  { %v529_v11 = vadd.s32 1, %v525_v2  ;;  %v2581_v44 = vor.u32 %v1235_v6, %v1234_v31  ;;  %v2583_v33 = vshrl.u32 %v1065_v45, 5  ;;  %v2586_v20 = vsub.s32 32, %v2564_v57 }
  0xea   :  { %v526_v28 = vmul.u32 %v2485_v14, %v472_v39  ;;  %v2592_v56 = vsel %vm2541_vm14, %v2114_v41, %v246_v17  ;;  %v391_v3 = vor.u32 %v390_v7, %v389_v38  ;;  %v595_v48 = vand.u32 8388607, %v3798_v34 }
  0xeb   :  { %3834 = vst [vmem:[#allocation22_spill] sm:$0xff] %v2581_v44  ;;  %v530_v51 = vsel %vm528_vm5, %v529_v11, %v525_v2  ;;  %v608_v45 = vshll.u32 %v3822_v61, %v2479_v25  ;;  %v609_v40 = vshrl.u32 %v3823_v8, %v2502_v19  ;;  %v611_v14 = vshll.u32 %v3823_v8, %v2479_v25 }
  0xec   :  { %v531_v1 = vadd.s32 %v530_v51, %v526_v28  ;;  %v1079_v18 = vshll.u32 %v3824_v22, %v2564_v57  ;;  %v1082_v62 = vshll.u32 %v3825_v35, %v2564_v57  ;;  %v396_v12 = vand.u32 2147483647, %v395_v42  ;;  %v3836_v28 = vld [vmem:[#allocation20_spill] sm:$0xff] }
  0xed   :  { %v612_v63 = vshrl.u32 %v3824_v22, %v2502_v19  ;;  %v1080_v23 = vshrl.u32 %v3825_v35, %v2586_v20  ;;  %v247_v0 = vsub.s32 4, %v2386_v24  ;;  %v2613_v54 = vmul.f32 %v2592_v56, %v2592_v56 }
  0xee   :  { %v532_v29 = vadd.s32 536870912, %v531_v1  ;;  %v398_v47 = vcvt.s32.f32 %v391_v3  ;;  %v605_v6 = vshll.u32 %v3821_v16, %v2479_v25  ;;  %v606_v7 = vshrl.u32 %v3822_v61, %v2502_v19 }
  0xef   :  { %vm622_vm0 = vcmp.lt.s32.totalorder %v2499_v60, 3  ;;  %vm280_vm1 = vcmp.lt.s32.totalorder %v2123_v53, 0  ;;  %v596_v35 = vor.u32 8388608, %v595_v48  ;;  %v2623_v2 = vor.u32 %v609_v40, %v608_v45 }
  0xf0   :  { %v2621_v39 = vshrl.u32 %v532_v29, 30  ;;  %v613_v31 = vor.u32 %v612_v63, %v611_v14  ;;  %v1083_v17 = vshrl.u32 %v3826_v37, %v2586_v20  ;;  %vm1088_vm2 = vcmp.lt.s32.totalorder %v2583_v33, 4  ;;  %v3837_v37 = vld [vmem:[#allocation19_spill] sm:$0xff] }
  0xf1   :  { %v399_v38 = vmul.f32 %v398_v47, %v396_v12  ;;  %vm620_vm3 = vcmp.lt.s32.totalorder %v2499_v60, 1  ;;  %v2632_v25 = vsel %vm1243_vm15, %v2581_v44, 920167782  ;;  %vm621_vm6 = vcmp.lt.s32.totalorder %v2499_v60, 2 }
  0xf2   :  { %3835 = vst [vmem:[#allocation23_spill] sm:$0xff] %v2632_v25  ;;  %v534_v42 = vshll.u32 %v2621_v39, 30  ;;  %v634_v11 = vsel %vm622_vm0, %v2527_v59, %v633_v27  ;;  %v3838_v3 = vor.u32 %v3836_v28, %v3837_v37  ;;  %v2646_v48 = vor.u32 %v1080_v23, %v1079_v18 }
  0xf3   :  { %v248_v45 = vsel %vm125_vm10, %v247_v0, %v2386_v24  ;;  %v607_v40 = vor.u32 %v606_v7, %v605_v6  ;;  %v252_v14 = vmul.f32 -0.001358992, %v2613_v54  ;;  %v632_v59 = vsel %vm620_vm3, %v2623_v2, %v613_v31 }
  0xf4   :  { %v2644_v51 = vsel %vm1243_vm15, %v3838_v3, 1326507024  ;;  %3840 = vst [vmem:[#allocation19_spill] sm:$0xff] %v2646_v48  ;;  %v2652_v12 = vsub.s32 %v531_v1, %v534_v42  ;;  %v2657_v27 = vshll.u32 %v596_v35, 8  ;;  %v1084_v63 = vor.u32 %v1083_v17, %v1082_v62 }
  0xf5   :  { %3839 = vst [vmem:[#allocation20_spill] sm:$0xff] %v2644_v51  ;;  %v259_v29 = vmul.f32 -0.00019511016, %v2613_v54  ;;  %v400_v18 = vxor.u32 2147483648, %v399_v38  ;;  %v635_v23 = vsel %vm621_vm6, %v632_v59, %v634_v11  ;;  %v250_v24 = vsel %vm2541_vm14, 0, %v248_v45 }
  0xf6   :  { %v3841_v0 = vand.u32 2147483647, %v2123_v53  ;;  %vm536_vm9 = vcmp.lt.s32.totalorder %v2652_v12, 0  ;;  %v537_v47 = vsub.s32 0, %v2652_v12  ;;  %v402_v62 = vsub.s32 4, %v2491_v49 }
  0xf7   :  { %v628_v6 = vsel %vm620_vm3, %v607_v40, %v2623_v2  ;;  %v630_v13 = vsel %vm622_vm0, %v613_v31, %v2560_v30  ;;  %v639_v7 = vand.u32 65535, %v635_v23  ;;  %v253_v35 = vadd.f32 0.041655596, %v252_v14 }
  0xf8   :  { %vm2666_vm8 = vcmp.le.f32.partialorder %v3841_v0, 0.7853982  ;;  %v538_v17 = vsel %vm536_vm9, %v537_v47, %v2652_v12  ;;  %v637_v42 = vand.u32 65535, %v2657_v27  ;;  %v640_v11 = vshrl.u32 %v635_v23, 16 }
  0xf9   :  { %v260_v28 = vadd.f32 0.008332121, %v259_v29  ;;  %v401_v37 = vsel %vm280_vm1, %v400_v18, %v399_v38  ;;  %v539_v3 = vclz %v538_v17  ;;  %v638_v45 = vshrl.u32 %v2657_v27, 16 }
  0xfa   :  { %v2687_v59 = vsel %vm1088_vm2, %v2646_v48, 920167782  ;;  %v2691_v30 = vsel %vm1088_vm2, %v1084_v63, 1326507024  ;;  %v631_v14 = vsel %vm621_vm6, %v628_v6, %v630_v13  ;;  %v642_v23 = vmul.u32 %v640_v11, %v637_v42 }
  0xfb   :  { %3844 = vst [vmem:[#allocation24_spill] sm:$0xff] %v2687_v59  ;;  %v267_v29 = vadd.s32 3, %v250_v24  ;;  %v2698_v38 = vsel %vm280_vm1, %v402_v62, %v2491_v49  ;;  %v1900_v18 = vadd.s32 4294967294, %v539_v3  ;;  %v2700_v0 = vmul.u32 %v639_v7, %v638_v45 }
  0xfc   :  { %3845 = vst [vmem:[#allocation25_spill] sm:$0xff] %v2691_v30  ;;  %v254_v47 = vmul.f32 %v253_v35, %v2613_v54  ;;  %v2706_v63 = vsel %vm2666_vm8, %v2123_v53, %v401_v37  ;;  %v641_v17 = vmul.u32 %v639_v7, %v637_v42  ;;  %v645_v34 = vshll.u32 %v642_v23, 16 }
  0xfd   :  { %v261_v6 = vmul.f32 %v260_v28, %v2613_v54  ;;  %vm1901_vm10 = vcmp.lt.s32.totalorder %v1900_v18, 0  ;;  %v604_v24 = vshrl.u32 %v3821_v16, %v2502_v19  ;;  %v662_v49 = vshrl.u32 %v631_v14, 16 }
  0xfe   :  { %v542_v62 = vsel %vm1901_vm10, 0, %v1900_v18  ;;  %v647_v13 = vshll.u32 %v2700_v0, 16  ;;  %vm649_vm12 = vc.u32 %v641_v17, %v645_v34  ;;  %v651_v3 = vadd.s32 %v645_v34, %v641_v17 }
  0xff   :  { %v2712_v35 = vand.u32 3, %v267_v29  ;;  %v2716_v37 = vmul.f32 %v2706_v63, %v2706_v63  ;;  %v644_v7 = vmul.u32 %v640_v11, %v638_v45  ;;  %v661_v25 = vand.u32 65535, %v631_v14 }
 0x100   :  { %v547_v44 = vsub.s32 4294967266, %v542_v62  ;;  %v625_v28 = vsel %vm623_vm7, %v613_v31, 2102212464  ;;  %v650_v19 = vsel %vm649_vm12, 1, %v3827_v55  ;;  %vm653_vm13 = vc.u32 %v651_v3, %v647_v13 }
 0x101   :  { %v255_v18 = vadd.f32 -0.4999988, %v254_v47  ;;  %v262_v51 = vadd.f32 -0.16666654, %v261_v6  ;;  %v652_v29 = vadd.s32 %v650_v19, %v644_v7  ;;  %v624_v46 = vsel %vm620_vm3, %v604_v24, %v607_v40 }
 0x102   :  { %v548_v17 = vadd.s32 127, %v547_v44  ;;  %v654_v11 = vsel %vm653_vm13, 1, %v3827_v55  ;;  %v664_v14 = vmul.u32 %v662_v49, %v637_v42  ;;  %v407_v21 = vmul.f32 -0.001358992, %v2716_v37 }
 0x103   :  { %v543_v31 = vsub.s32 32, %v542_v62  ;;  %v626_v47 = vsel %vm622_vm0, %v2623_v2, %v625_v28  ;;  %v665_v6 = vmul.u32 %v661_v25, %v638_v45  ;;  %v414_v13 = vmul.f32 -0.00019511016, %v2716_v37 }
 0x104   :  { %v656_v3 = vadd.s32 %v654_v11, %v652_v29  ;;  %v663_v34 = vmul.u32 %v661_v25, %v637_v42  ;;  %v667_v7 = vshll.u32 %v664_v14, 16  ;;  %v256_v44 = vmul.f32 %v255_v18, %v2613_v54 }
 0x105   :  { %v263_v40 = vmul.f32 %v262_v51, %v2613_v54  ;;  %v527_v24 = vadd.s32 %v2566_v5, %v2553_v10  ;;  %v549_v19 = vshll.u32 %v548_v17, 23  ;;  %v627_v4 = vsel %vm621_vm6, %v624_v46, %v626_v47  ;;  %v3846_v10 = vld [vmem:[#allocation8_spill] sm:$0xff] }
 0x106   :  { %v646_v59 = vshrl.u32 %v642_v23, 16  ;;  %v666_v48 = vmul.u32 %v662_v49, %v638_v45  ;;  %vm671_vm7 = vc.u32 %v663_v34, %v667_v7  ;;  %v669_v28 = vshll.u32 %v665_v6, 16  ;;  %v3847_v45 = vld [vmem:[#allocation10_spill] sm:$0xff]  ;;  %v3848_v49 = vld [vmem:[#allocation11_spill] sm:$0xff] }
 0x107   :  { %v545_v2 = vshrl.u32 %v527_v24, %v543_v31  ;;  %v672_v29 = vsel %vm671_vm7, 1, %v3827_v55  ;;  %v673_v25 = vadd.s32 %v667_v7, %v663_v34  ;;  %v408_v42 = vadd.f32 0.041655596, %v407_v21 }
 0x108   :  { %v415_v11 = vadd.f32 0.008332121, %v414_v13  ;;  %v657_v18 = vadd.s32 %v656_v3, %v646_v59  ;;  %v674_v30 = vadd.s32 %v672_v29, %v666_v48  ;;  %v544_v54 = vshll.u32 %v2652_v12, %v542_v62 }
 0x109   :  { %v550_v51 = vor.u32 4788187, %v549_v19  ;;  %vm675_vm14 = vc.u32 %v673_v25, %v669_v28  ;;  %v743_v5 = vand.u32 2147483647, %v3846_v10  ;;  %v648_v60 = vshrl.u32 %v2700_v0, 16 }
 0x10a   :  { %v676_v46 = vsel %vm675_vm14, 1, %v3827_v55  ;;  %v760_v23 = vshll.u32 %v3821_v16, %v3847_v45  ;;  %v761_v34 = vshrl.u32 %v3822_v61, %v3848_v49  ;;  %v546_v21 = vor.u32 %v545_v2, %v544_v54 }
 0x10b   :  { %v668_v17 = vshrl.u32 %v664_v14, 16  ;;  %v678_v59 = vadd.s32 %v676_v46, %v674_v30  ;;  %v750_v48 = vand.u32 8388607, %v743_v5  ;;  %v2749_v12 = vadd.s32 %v657_v18, %v648_v60 }
 0x10c   :  { %v670_v62 = vshrl.u32 %v665_v6, 16  ;;  %v763_v0 = vshll.u32 %v3822_v61, %v3847_v45  ;;  %v764_v31 = vshrl.u32 %v3823_v8, %v3848_v49  ;;  %v551_v47 = vand.u32 2147483647, %v550_v51 }
 0x10d   :  { %v679_v13 = vadd.s32 %v678_v59, %v668_v17  ;;  %v766_v3 = vshll.u32 %v3823_v8, %v3847_v45  ;;  %v767_v30 = vshrl.u32 %v3824_v22, %v3848_v49  ;;  %v2759_v14 = vadd.s32 %v673_v25, %v669_v28  ;;  %v3849_v28 = vld [vmem:[#allocation13_spill] sm:$0xff] }
 0x10e   :  { %v2761_v7 = vor.u32 %v761_v34, %v760_v23  ;;  %v2763_v24 = vor.u32 %v764_v31, %v763_v0  ;;  %vm775_vm5 = vcmp.lt.s32.totalorder %v2140_v9, 1  ;;  %v751_v19 = vor.u32 8388608, %v750_v48 }
 0x10f   :  { %v680_v6 = vadd.s32 %v679_v13, %v670_v62  ;;  %v2766_v2 = vor.u32 %v767_v30, %v766_v3  ;;  %vm777_vm0 = vcmp.lt.s32.totalorder %v2140_v9, 3  ;;  %v416_v29 = vmul.f32 %v415_v11, %v2716_v37 }
 0x110   :  { %vm683_vm1 = vc.u32 %v2749_v12, %v2759_v14  ;;  %vm776_vm3 = vcmp.lt.s32.totalorder %v2140_v9, 2  ;;  %v789_v25 = vsel %vm777_vm0, %v3849_v28, %v2470_v58  ;;  %v264_v18 = vadd.f32 1.0, %v263_v40  ;;  %v3850_v58 = vld [vmem:[#allocation15_spill] sm:$0xff]  ;;  %v3857_v9 = vld [vmem:[#allocation16_spill] sm:$0xff] }
 0x111   :  { %v553_v54 = vcvt.s32.f32 %v546_v21  ;;  %v684_v51 = vadd.s32 1, %v680_v6  ;;  %v787_v60 = vsel %vm775_vm5, %v2763_v24, %v2766_v2  ;;  %vm435_vm6 = vcmp.lt.s32.totalorder %v2120_v50, 0 }
 0x112   :  { %v409_v11 = vmul.f32 %v408_v42, %v2716_v37  ;;  %v681_v46 = vmul.u32 %v2657_v27, %v627_v4  ;;  %v783_v45 = vsel %vm775_vm5, %v2761_v7, %v2763_v24  ;;  %v785_v40 = vsel %vm777_vm0, %v2766_v2, %v3850_v58 }
 0x113   :  { %v554_v23 = vmul.f32 %v553_v54, %v551_v47  ;;  %v685_v34 = vsel %vm683_vm1, %v684_v51, %v680_v6  ;;  %v790_v21 = vsel %vm776_vm3, %v787_v60, %v789_v25  ;;  %v2794_v17 = vshll.u32 %v751_v19, 8 }
 0x114   :  { %v257_v42 = vadd.f32 1.0, %v256_v44  ;;  %v417_v59 = vadd.f32 -0.16666654, %v416_v29  ;;  %v686_v4 = vadd.s32 %v685_v34, %v681_v46  ;;  %v794_v27 = vand.u32 65535, %v790_v21 }
 0x115   :  { %v786_v48 = vsel %vm776_vm3, %v783_v45, %v785_v40  ;;  %v792_v62 = vand.u32 65535, %v2794_v17  ;;  %v793_v0 = vshrl.u32 %v2794_v17, 16  ;;  %v795_v31 = vshrl.u32 %v790_v21, 16 }
 0x116   :  { %v265_v47 = vmul.f32 %v264_v18, %v2592_v56  ;;  %v410_v13 = vadd.f32 -0.4999988, %v409_v11  ;;  %v3851_v3 = vand.u32 2147483647, %v2120_v50  ;;  %v687_v44 = vadd.s32 536870912, %v686_v4 }
 0x117   :  { %v555_v6 = vxor.u32 2147483648, %v554_v23  ;;  %v796_v19 = vmul.u32 %v794_v27, %v792_v62  ;;  %v2807_v29 = vmul.u32 %v795_v31, %v792_v62  ;;  %v2809_v28 = vmul.u32 %v794_v27, %v793_v0 }
 0x118   :  { %vm2803_vm9 = vcmp.le.f32.partialorder %v3851_v3, 0.7853982  ;;  %vm270_vm10 = vcmp.eq.s32.totalorder %v2712_v35, 0  ;;  %v3854_v56 = vsel %vm2666_vm8, 0, %v2698_v38  ;;  %v2816_v18 = vshrl.u32 %v687_v44, 30  ;;  %v1445_v3 = vld [vmem:[#allocation4 + $0x78] sm:$0xff] }
 0x119   :  { %v422_v25 = vadd.s32 3, %v3854_v56  ;;  %v817_v54 = vshrl.u32 %v786_v48, 16  ;;  %vm269_vm12 = vcmp.lt.s32.totalorder %v2712_v35, 2  ;;  %v274_v51 = vxor.u32 2147483648, %v257_v42  ;;  %1448 = vmatpush.msra.mxu1 %v1445_v3 }
 0x11a   :  { %v418_v60 = vmul.f32 %v417_v59, %v2716_v37  ;;  %v800_v11 = vshll.u32 %v2807_v29, 16  ;;  %v802_v46 = vshll.u32 %v2809_v28, 16  ;;  %v271_v45 = vxor.u32 2147483648, %v265_v47 }
 0x11b   :  { %v411_v58 = vmul.f32 %v410_v13, %v2716_v37  ;;  %v689_v1 = vshll.u32 %v2816_v18, 30  ;;  %v816_v40 = vand.u32 65535, %v786_v48  ;;  %v556_v38 = vsel %vm435_vm6, %v555_v6, %v554_v23 }
 0x11c   :  { %v799_v34 = vmul.u32 %v795_v31, %v793_v0  ;;  %vm804_vm8 = vc.u32 %v796_v19, %v800_v11  ;;  %v806_v21 = vadd.s32 %v800_v11, %v796_v19  ;;  %vm273_vm13 = vcmp.eq.s32.totalorder %v2712_v35, 2  ;;  %v1444_v31 = vld [vmem:[#allocation4 + $0x70] sm:$0xff] }
 0x11d   :  { %v2827_v27 = vand.u32 3, %v422_v25  ;;  %v2829_v59 = vsub.s32 %v686_v4, %v689_v1  ;;  %v2831_v44 = vmul.u32 %v817_v54, %v792_v62  ;;  %v419_v56 = vadd.f32 1.0, %v418_v60  ;;  %1449 = vmatpush.msra.mxu1 %v1444_v31 }
 0x11e   :  { %v557_v37 = vsub.s32 4, %v2621_v39  ;;  %v805_v48 = vsel %vm804_vm8, 1, %v3827_v55  ;;  %vm808_vm7 = vc.u32 %v806_v21, %v802_v46  ;;  %v2838_v23 = vsel %vm2803_vm9, %v2120_v50, %v556_v38 }
 0x11f   :  { %vm691_vm14 = vcmp.lt.s32.totalorder %v2829_v59, 0  ;;  %v692_v4 = vsub.s32 0, %v2829_v59  ;;  %v818_v13 = vmul.u32 %v816_v40, %v792_v62  ;;  %v272_v6 = vsel %vm270_vm10, %v257_v42, %v271_v45 }
 0x120   :  { %v275_v19 = vsel %vm273_vm13, %v274_v51, %v265_v47  ;;  %v2846_v25 = vadd.f32 1.0, %v411_v58  ;;  %v807_v60 = vadd.s32 %v805_v48, %v799_v34  ;;  %v809_v46 = vsel %vm808_vm7, 1, %v3827_v55 }
 0x121   :  { %v693_v11 = vsel %vm691_vm14, %v692_v4, %v2829_v59  ;;  %v820_v1 = vmul.u32 %v816_v40, %v793_v0  ;;  %v822_v38 = vshll.u32 %v2831_v44, 16  ;;  %v2852_v21 = vmul.f32 %v419_v56, %v2706_v63 }
 0x122   :  { %v2857_v42 = vsel %vm435_vm6, %v557_v37, %v2621_v39  ;;  %v2861_v62 = vmul.f32 %v2838_v23, %v2838_v23  ;;  %v694_v47 = vclz %v693_v11  ;;  %v2865_v51 = vsel %vm269_vm12, %v272_v6, %v275_v19 }
 0x123   :  { %v759_v45 = vshrl.u32 %v3821_v16, %v3848_v49  ;;  %v821_v58 = vmul.u32 %v817_v54, %v793_v0  ;;  %vm826_vm1 = vc.u32 %v818_v13, %v822_v38  ;;  %v780_v39 = vsel %vm778_vm4, %v2766_v2, 2102212464 }
 0x124   :  { %v1903_v63 = vadd.s32 4294967294, %v694_v47  ;;  %v801_v40 = vshrl.u32 %v2807_v29, 16  ;;  %v811_v34 = vadd.s32 %v809_v46, %v807_v60  ;;  %v429_v3 = vxor.u32 2147483648, %v2846_v25  ;;  %v3855_v46 = vld [vmem:[#allocation9_spill] sm:$0xff] }
 0x125   :  { %v560_v35 = vsel %vm2803_vm9, 0, %v2857_v42  ;;  %v824_v56 = vshll.u32 %v820_v1, 16  ;;  %v827_v37 = vsel %vm826_vm1, 1, %v3827_v55  ;;  %v426_v49 = vxor.u32 2147483648, %v2852_v21 }
 0x126   :  { %v569_v0 = vmul.f32 -0.00019511016, %v2861_v62  ;;  %vm1904_vm6 = vcmp.lt.s32.totalorder %v1903_v63, 0  ;;  %v828_v54 = vadd.s32 %v822_v38, %v818_v13  ;;  %v779_v2 = vsel %vm775_vm5, %v759_v45, %v2761_v7 }
 0x127   :  { %v697_v48 = vsel %vm1904_vm6, 0, %v1903_v63  ;;  %v781_v29 = vsel %vm777_vm0, %v2763_v24, %v780_v39  ;;  %v829_v4 = vadd.s32 %v827_v37, %v821_v58  ;;  %v682_v31 = vadd.s32 %v2759_v14, %v2749_v12 }
 0x128   :  { %v702_v6 = vsub.s32 4294967266, %v697_v48  ;;  %v803_v19 = vshrl.u32 %v2809_v28, 16  ;;  %v812_v60 = vadd.s32 %v811_v34, %v801_v40  ;;  %v562_v11 = vmul.f32 -0.001358992, %v2861_v62 }
 0x129   :  { %v823_v13 = vshrl.u32 %v2831_v44, 16  ;;  %vm830_vm4 = vc.u32 %v828_v54, %v824_v56  ;;  %v898_v38 = vand.u32 2147483647, %v3855_v46  ;;  %v570_v7 = vadd.f32 0.008332121, %v569_v0  ;;  %v3856_v44 = vld [vmem:[#allocation14_spill] sm:$0xff] }
 0x12a   :  { %v703_v47 = vadd.s32 127, %v702_v6  ;;  %v782_v24 = vsel %vm776_vm3, %v779_v2, %v781_v29  ;;  %v831_v45 = vsel %vm830_vm4, 1, %v3827_v55  ;;  %vm425_vm5 = vcmp.eq.s32.totalorder %v2827_v27, 0 }
 0x12b   :  { %vm428_vm0 = vcmp.eq.s32.totalorder %v2827_v27, 2  ;;  %v825_v12 = vshrl.u32 %v820_v1, 16  ;;  %v833_v14 = vadd.s32 %v831_v45, %v829_v4  ;;  %v905_v28 = vand.u32 8388607, %v898_v38 }
 0x12c   :  { %v915_v58 = vshll.u32 %v3821_v16, %v3856_v44  ;;  %v2901_v63 = vadd.s32 %v812_v60, %v803_v19  ;;  %v2903_v39 = vadd.s32 %v828_v54, %v824_v56  ;;  %v916_v40 = vshrl.u32 %v3822_v61, %v3857_v9 }
 0x12d   :  { %v918_v34 = vshll.u32 %v3822_v61, %v3856_v44  ;;  %v563_v37 = vadd.f32 0.041655596, %v562_v11  ;;  %v698_v0 = vsub.s32 32, %v697_v48  ;;  %v834_v1 = vadd.s32 %v833_v14, %v823_v13 }
 0x12e   :  { %v919_v2 = vshrl.u32 %v3823_v8, %v3857_v9  ;;  %vm424_vm3 = vcmp.lt.s32.totalorder %v2827_v27, 2  ;;  %v571_v29 = vmul.f32 %v570_v7, %v2861_v62  ;;  %v704_v4 = vshll.u32 %v703_v47, 23 }
 0x12f   :  { %v906_v6 = vor.u32 8388608, %v905_v28  ;;  %v921_v56 = vshll.u32 %v3823_v8, %v3856_v44  ;;  %vm266_vm10 = vweird.f32 %v2114_v41  ;;  %v835_v54 = vadd.s32 %v834_v1, %v825_v12  ;;  %v2982_v41 = vld [vmem:[%s3759_s1 + $0x2] ss:$0 sm:$0xff] }
 0x130   :  { %v2916_v19 = vor.u32 %v916_v40, %v915_v58  ;;  %v2918_v60 = vor.u32 %v919_v2, %v918_v34  ;;  %v922_v11 = vshrl.u32 %v3824_v22, %v3857_v9  ;;  %v836_v13 = vmul.u32 %v2794_v17, %v782_v24 }
 0x131   :  { %vm838_vm12 = vc.u32 %v2901_v63, %v2903_v39  ;;  %vm930_vm8 = vcmp.lt.s32.totalorder %v2174_v32, 1  ;;  %vm932_vm13 = vcmp.lt.s32.totalorder %v2174_v32, 3  ;;  %v699_v7 = vshll.u32 %v2829_v59, %v697_v48 }
 0x132   :  { %v700_v47 = vshrl.u32 %v682_v31, %v698_v0  ;;  %v839_v45 = vadd.s32 1, %v835_v54  ;;  %v2928_v12 = vor.u32 %v922_v11, %v921_v56  ;;  %v705_v14 = vor.u32 4788187, %v704_v4 }
 0x133   :  { %vm931_vm7 = vcmp.lt.s32.totalorder %v2174_v32, 2  ;;  %v944_v17 = vsel %vm932_vm13, %v2374_v43, %v2497_v52  ;;  %v2935_v24 = vshll.u32 %v906_v6, 8  ;;  %v938_v59 = vsel %vm930_vm8, %v2916_v19, %v2918_v60 }
 0x134   :  { %v840_v28 = vsel %vm838_vm12, %v839_v45, %v835_v54  ;;  %v940_v48 = vsel %vm932_vm13, %v2928_v12, %v2477_v36  ;;  %v942_v31 = vsel %vm930_vm8, %v2918_v60, %v2928_v12  ;;  %v427_v43 = vsel %vm425_vm5, %v2846_v25, %v426_v49 }
 0x135   :  { %v430_v52 = vsel %vm428_vm0, %v429_v3, %v2852_v21  ;;  %v564_v44 = vmul.f32 %v563_v37, %v2861_v62  ;;  %v841_v58 = vadd.s32 %v840_v28, %v836_v13  ;;  %v701_v40 = vor.u32 %v700_v47, %v699_v7 }
 0x136   :  { %v945_v36 = vsel %vm931_vm7, %v942_v31, %v944_v17  ;;  %v947_v34 = vand.u32 65535, %v2935_v24  ;;  %v948_v0 = vshrl.u32 %v2935_v24, 16  ;;  %v941_v49 = vsel %vm931_vm7, %v938_v59, %v940_v48 }
 0x137   :  { %v842_v1 = vadd.s32 536870912, %v841_v58  ;;  %v949_v2 = vand.u32 65535, %v945_v36  ;;  %v950_v25 = vshrl.u32 %v945_v36, 16  ;;  %vm421_vm14 = vweird.f32 %v2123_v53 }
 0x138   :  { %v431_v21 = vsel %vm424_vm3, %v427_v43, %v430_v52  ;;  %v572_v3 = vadd.f32 -0.16666654, %v571_v29  ;;  %v706_v37 = vand.u32 2147483647, %v705_v14  ;;  %v277_v4 = vsel %vm266_vm10, nan, %v2865_v51 }
 0x139   :  { %v577_v6 = vadd.s32 3, %v560_v35  ;;  %v2974_v56 = vshrl.u32 %v842_v1, 30  ;;  %v952_v54 = vmul.u32 %v950_v25, %v947_v34  ;;  %v708_v11 = vcvt.s32.f32 %v701_v40 }
 0x13a   :  { %v951_v13 = vmul.u32 %v949_v2, %v947_v34  ;;  %v2976_v53 = vmul.u32 %v949_v2, %v948_v0  ;;  %v972_v27 = vshrl.u32 %v941_v49, 16  ;;  %vm590_vm1 = vcmp.lt.s32.totalorder %v2167_v26, 0 }
 0x13b   :  { %v432_v51 = vsel %vm421_vm14, nan, %v431_v21  ;;  %v565_v30 = vadd.f32 -0.4999988, %v564_v44  ;;  %v844_v42 = vshll.u32 %v2974_v56, 30  ;;  %v573_v35 = vmul.f32 %v572_v3, %v2861_v62 }
 0x13c   :  { %v709_v29 = vmul.f32 %v708_v11, %v706_v37  ;;  %v955_v7 = vshll.u32 %v952_v54, 16  ;;  %v957_v47 = vshll.u32 %v2976_v53, 16  ;;  %v2988_v45 = vadd.f32 %v2982_v41, %v277_v4 }
 0x13d   :  { %v845_v14 = vsub.s32 %v841_v58, %v844_v42  ;;  %v954_v17 = vmul.u32 %v950_v25, %v948_v0  ;;  %v971_v28 = vand.u32 65535, %v941_v49  ;;  %v2990_v59 = vand.u32 3, %v577_v6 }
 0x13e   :  { %v3858_v48 = vand.u32 2147483647, %v2167_v26  ;;  %vm959_vm6 = vc.u32 %v951_v13, %v955_v7  ;;  %v961_v43 = vadd.s32 %v955_v7, %v951_v13  ;;  %v974_v52 = vmul.u32 %v972_v27, %v947_v34 }
 0x13f   :  { %v2999_v44 = vadd.f32 %v2982_v41, %v432_v51  ;;  %v566_v40 = vmul.f32 %v565_v30, %v2861_v62  ;;  %vm846_vm4 = vcmp.lt.s32.totalorder %v845_v14, 0  ;;  %v847_v58 = vsub.s32 0, %v845_v14 }
 0x140   :  { %vm2994_vm9 = vcmp.le.f32.partialorder %v3858_v48, 0.7853982  ;;  %v574_v36 = vadd.f32 1.0, %v573_v35  ;;  %v710_v1 = vxor.u32 2147483648, %v709_v29  ;;  %v960_v49 = vsel %vm959_vm6, 1, %v3827_v55 }
 0x141   :  { %vm963_vm5 = vc.u32 %v961_v43, %v957_v47  ;;  %v848_v2 = vsel %vm846_vm4, %v847_v58, %v845_v14  ;;  %v914_v25 = vshrl.u32 %v3821_v16, %v3857_v9  ;;  %v962_v21 = vadd.s32 %v960_v49, %v954_v17 }
 0x142   :  { %v975_v3 = vmul.u32 %v971_v28, %v948_v0  ;;  %v849_v37 = vclz %v848_v2  ;;  %v964_v4 = vsel %vm963_vm5, 1, %v3827_v55  ;;  %v973_v6 = vmul.u32 %v971_v28, %v947_v34 }
 0x143   :  { %v977_v11 = vshll.u32 %v974_v52, 16  ;;  %v3006_v13 = vadd.f32 1.0, %v566_v40  ;;  %v712_v62 = vsub.s32 4, %v2816_v18  ;;  %v956_v51 = vshrl.u32 %v952_v54, 16 }
 0x144   :  { %v966_v30 = vadd.s32 %v964_v4, %v962_v21  ;;  %v3010_v42 = vmul.f32 %v574_v36, %v2838_v23  ;;  %v711_v35 = vsel %vm590_vm1, %v710_v1, %v709_v29  ;;  %v837_v9 = vadd.s32 %v2903_v39, %v2901_v63 }
 0x145   :  { %v1906_v7 = vadd.s32 4294967294, %v849_v37  ;;  %v934_v34 = vsel %vm930_vm8, %v914_v25, %v2916_v19  ;;  %v976_v47 = vmul.u32 %v972_v27, %v948_v0  ;;  %v979_v17 = vshll.u32 %v975_v3, 16 }
 0x146   :  { %v1053_v28 = vand.u32 2147483647, %v2427_v15  ;;  %v935_v23 = vsel %vm933_vm11, %v2928_v12, 2102212464  ;;  %vm981_vm3 = vc.u32 %v973_v6, %v977_v11  ;;  %v983_v54 = vadd.s32 %v977_v11, %v973_v6 }
 0x147   :  { %vm1907_vm0 = vcmp.lt.s32.totalorder %v1906_v7, 0  ;;  %v3026_v63 = vsel %vm2994_vm9, %v2167_v26, %v711_v35  ;;  %v958_v29 = vshrl.u32 %v2976_v53, 16  ;;  %v967_v19 = vadd.s32 %v966_v30, %v956_v51 }
 0x148   :  { %v852_v39 = vsel %vm1907_vm0, 0, %v1906_v7  ;;  %v982_v43 = vsel %vm981_vm3, 1, %v3827_v55  ;;  %v936_v12 = vsel %vm932_vm13, %v2918_v60, %v935_v23  ;;  %v978_v40 = vshrl.u32 %v974_v52, 16  ;;  %v1441_v7 = vld [vmem:[#allocation4 + $0x58] sm:$0xff]  ;;  %v1406_v23 = vpop.f32.mrf.mxu0 }
 0x149   :  { %v853_v0 = vsub.s32 32, %v852_v39  ;;  %v854_v27 = vshll.u32 %v845_v14, %v852_v39  ;;  %v857_v48 = vsub.s32 4294967266, %v852_v39  ;;  %v984_v58 = vadd.s32 %v982_v43, %v976_v47 }
 0x14a   :  { %vm985_vm11 = vc.u32 %v983_v54, %v979_v17  ;;  %v3035_v36 = vmul.f32 %v3026_v63, %v3026_v63  ;;  %v3038_v2 = vadd.s32 %v967_v19, %v958_v29  ;;  %v980_v14 = vshrl.u32 %v975_v3, 16  ;;  %v1443_v3 = vld [vmem:[#allocation4 + $0x68] sm:$0xff] }
 0x14b   :  { %v855_v1 = vshrl.u32 %v837_v9, %v853_v0  ;;  %v858_v49 = vadd.s32 127, %v857_v48  ;;  %v986_v53 = vsel %vm985_vm11, 1, %v3827_v55  ;;  %v3040_v25 = vadd.s32 %v983_v54, %v979_v17  ;;  %1450 = vmatpush.msra.mxu1 %v1443_v3  ;;  %v1442_v9 = vld [vmem:[#allocation4 + $0x60] sm:$0xff]  ;;  %v1440_v0 = vld [vmem:[#allocation4 + $0x50] sm:$0xff] }
 0x14c   :  { %v988_v21 = vadd.s32 %v986_v53, %v984_v58  ;;  %v3045_v60 = vsel %vm590_vm1, %v712_v62, %v2816_v18  ;;  %v937_v4 = vsel %vm931_vm7, %v934_v34, %v936_v12  ;;  %vm745_vm10 = vcmp.lt.s32.totalorder %v3846_v10, 0 }
 0x14d   :  { %v856_v52 = vor.u32 %v855_v1, %v854_v27  ;;  %v859_v37 = vshll.u32 %v858_v49, 23  ;;  %v581_v6 = vxor.u32 2147483648, %v3010_v42  ;;  %v584_v11 = vxor.u32 2147483648, %v3006_v13  ;;  %1451 = vmatpush.msra.mxu1 %v1442_v9 }
 0x14e   :  { %v989_v51 = vadd.s32 %v988_v21, %v978_v40  ;;  %v1060_v30 = vand.u32 8388607, %v1053_v28  ;;  %vm580_vm12 = vcmp.eq.s32.totalorder %v2990_v59, 0  ;;  %vm583_vm8 = vcmp.eq.s32.totalorder %v2990_v59, 2 }
 0x14f   :  { %v717_v18 = vmul.f32 -0.001358992, %v3035_v36  ;;  %v724_v32 = vmul.f32 -0.00019511016, %v3035_v36  ;;  %v860_v62 = vor.u32 4788187, %v859_v37  ;;  %v863_v35 = vcvt.s32.f32 %v856_v52  ;;  %1452 = vmatpush.msra.mxu1 %v1441_v7 }
 0x150   :  { %v990_v34 = vadd.s32 %v989_v51, %v980_v14  ;;  %v991_v47 = vmul.u32 %v2935_v24, %v937_v4  ;;  %vm993_vm13 = vc.u32 %v3038_v2, %v3040_v25  ;;  %v1071_v17 = vshrl.u32 %v3822_v61, %v2586_v20  ;;  %v3861_v52 = vld [vmem:[#allocation25_spill] sm:$0xff]  ;;  %v3862_v37 = vld [vmem:[#allocation19_spill] sm:$0xff] }
 0x151   :  { %v861_v54 = vand.u32 2147483647, %v860_v62  ;;  %v1061_v39 = vor.u32 8388608, %v1060_v30  ;;  %v1073_v29 = vshll.u32 %v3822_v61, %v2564_v57  ;;  %v1074_v19 = vshrl.u32 %v3823_v8, %v2586_v20  ;;  %1453 = vmatpush.msra.mxu1 %v1440_v0 }
 0x152   :  { %vm579_vm7 = vcmp.lt.s32.totalorder %v2990_v59, 2  ;;  %v994_v24 = vadd.s32 1, %v990_v34  ;;  %v1070_v27 = vshll.u32 %v3821_v16, %v2564_v57  ;;  %v1076_v48 = vshll.u32 %v3823_v8, %v2564_v57 }
 0x153   :  { %v1077_v43 = vshrl.u32 %v3824_v22, %v2586_v20  ;;  %v718_v12 = vadd.f32 0.041655596, %v717_v18  ;;  %v725_v40 = vadd.f32 0.008332121, %v724_v32  ;;  %v864_v58 = vmul.f32 %v863_v35, %v861_v54 }
 0x154   :  { %v3074_v1 = vor.u32 %v1074_v19, %v1073_v29  ;;  %v995_v49 = vsel %vm993_vm13, %v994_v24, %v990_v34  ;;  %v3079_v53 = vor.u32 %v1071_v17, %v1070_v27  ;;  %vm1087_vm14 = vcmp.lt.s32.totalorder %v2583_v33, 3 }
 0x155   :  { %v3081_v14 = vor.u32 %v1077_v43, %v1076_v48  ;;  %vm576_vm1 = vweird.f32 %v2120_v50  ;;  %v865_v57 = vxor.u32 2147483648, %v864_v58  ;;  %v996_v21 = vadd.s32 %v995_v49, %v991_v47  ;;  %v3865_v47 = vld [vmem:[#allocation24_spill] sm:$0xff] }
 0x156   :  { %vm1085_vm6 = vcmp.lt.s32.totalorder %v2583_v33, 1  ;;  %v1099_v4 = vsel %vm1087_vm14, %v3862_v37, %v3861_v52  ;;  %v715_v3 = vsel %vm2994_vm9, 0, %v3045_v60  ;;  %vm3095_vm4 = vcmp.le.f32.partialorder %v743_v5, 0.7853982 }
 0x157   :  { %v1097_v30 = vsel %vm1085_vm6, %v3074_v1, %v3081_v14  ;;  %v3103_v18 = vshll.u32 %v1061_v39, 8  ;;  %v719_v32 = vmul.f32 %v718_v12, %v3035_v36  ;;  %v866_v62 = vsel %vm745_vm10, %v865_v57, %v864_v58  ;;  %v1409_v39 = vpop.f32.mrf.mxu0 }
 0x158   :  { %v997_v31 = vadd.s32 536870912, %v996_v21  ;;  %vm1086_vm9 = vcmp.lt.s32.totalorder %v2583_v33, 2  ;;  %v582_v5 = vsel %vm580_vm12, %v3006_v13, %v581_v6  ;;  %v585_v60 = vsel %vm583_vm8, %v584_v11, %v3010_v42 }
 0x159   :  { %v726_v35 = vmul.f32 %v725_v40, %v3035_v36  ;;  %v1100_v9 = vsel %vm1086_vm9, %v1097_v30, %v1099_v4  ;;  %v1093_v34 = vsel %vm1085_vm6, %v3079_v53, %v3074_v1  ;;  %v1095_v13 = vsel %vm1087_vm14, %v3081_v14, %v3865_v47 }
 0x15a   :  { %v3118_v7 = vshrl.u32 %v997_v31, 30  ;;  %v1104_v6 = vand.u32 65535, %v1100_v9  ;;  %v3131_v42 = vsel %vm3095_vm4, %v3846_v10, %v866_v62  ;;  %v3134_v11 = vand.u32 65535, %v3103_v18 }
 0x15b   :  { %v3137_v17 = vshrl.u32 %v3103_v18, 16  ;;  %v1105_v54 = vshrl.u32 %v1100_v9, 16  ;;  %v586_v29 = vsel %vm579_vm7, %v582_v5, %v585_v60  ;;  %v720_v19 = vadd.f32 -0.4999988, %v719_v32 }
 0x15c   :  { %v867_v0 = vsub.s32 4, %v2974_v56  ;;  %v999_v24 = vshll.u32 %v3118_v7, 30  ;;  %v3144_v27 = vadd.f32 %v1406_v23, %v2988_v45  ;;  %v3147_v48 = vadd.f32 %v1409_v39, %v2999_v44 }
 0x15d   :  { %v1107_v43 = vmul.u32 %v1105_v54, %v3134_v11  ;;  %v3151_v12 = vmul.u32 %v1104_v6, %v3137_v17  ;;  %v732_v40 = vadd.s32 3, %v715_v3  ;;  %v3155_v59 = vmul.f32 %v3131_v42, %v3131_v42 }
 0x15e   :  { %v1000_v58 = vsub.s32 %v996_v21, %v999_v24  ;;  %v1096_v49 = vsel %vm1086_vm9, %v1093_v34, %v1095_v13  ;;  %v587_v45 = vsel %vm576_vm1, nan, %v586_v29  ;;  %v727_v23 = vadd.f32 -0.16666654, %v726_v35 }
 0x15f   :  { %v1106_v44 = vmul.u32 %v1104_v6, %v3134_v11  ;;  %v1110_v57 = vshll.u32 %v1107_v43, 16  ;;  %v721_v52 = vmul.f32 %v720_v19, %v3035_v36  ;;  %v3166_v37 = vsel %vm745_vm10, %v867_v0, %v2974_v56 }
 0x160   :  { %vm1001_vm5 = vcmp.lt.s32.totalorder %v1000_v58, 0  ;;  %v1002_v4 = vsub.s32 0, %v1000_v58  ;;  %v1112_v21 = vshll.u32 %v3151_v12, 16  ;;  %v1127_v30 = vshrl.u32 %v1096_v49, 16 }
 0x161   :  { %vm1114_vm0 = vc.u32 %v1106_v44, %v1110_v57  ;;  %v1116_v3 = vadd.s32 %v1110_v57, %v1106_v44  ;;  %v879_v50 = vmul.f32 -0.00019511016, %v3155_v59  ;;  %v1109_v62 = vmul.u32 %v1105_v54, %v3137_v17 }
 0x162   :  { %v1003_v32 = vsel %vm1001_vm5, %v1002_v4, %v1000_v58  ;;  %v1115_v31 = vsel %vm1114_vm0, 1, %v3827_v55  ;;  %v728_v5 = vmul.f32 %v727_v23, %v3035_v36  ;;  %v3173_v60 = vand.u32 3, %v732_v40 }
 0x163   :  { %v1004_v56 = vclz %v1003_v32  ;;  %vm1118_vm3 = vc.u32 %v1116_v3, %v1112_v21  ;;  %v3176_v35 = vadd.f32 %v2982_v41, %v587_v45  ;;  %v870_v9 = vsel %vm3095_vm4, 0, %v3166_v37 }
 0x164   :  { %v1117_v34 = vadd.s32 %v1115_v31, %v1109_v62  ;;  %v1126_v47 = vand.u32 65535, %v1096_v49  ;;  %v1069_v6 = vshrl.u32 %v3821_v16, %v2586_v20  ;;  %v1090_v36 = vsel %vm1088_vm2, %v3081_v14, 2102212464  ;;  %v3866_v62 = vld [vmem:[#allocation12_spill] sm:$0xff] }
 0x165   :  { %v1909_v13 = vadd.s32 4294967294, %v1004_v56  ;;  %v1119_v54 = vsel %vm1118_vm3, 1, %v3827_v55  ;;  %v3187_v39 = vadd.f32 1.0, %v721_v52  ;;  %v872_v29 = vmul.f32 -0.001358992, %v3155_v59 }
 0x166   :  { %v880_v19 = vadd.f32 0.008332121, %v879_v50  ;;  %v1129_v0 = vmul.u32 %v1127_v30, %v3134_v11  ;;  %v729_v24 = vadd.f32 1.0, %v728_v5  ;;  %v992_v40 = vadd.s32 %v3040_v25, %v3038_v2 }
 0x167   :  { %vm1910_vm11 = vcmp.lt.s32.totalorder %v1909_v13, 0  ;;  %v1089_v20 = vsel %vm1085_vm6, %v1069_v6, %v3079_v53  ;;  %v1091_v14 = vsel %vm1087_vm14, %v3074_v1, %v1090_v36  ;;  %v1121_v45 = vadd.s32 %v1119_v54, %v1117_v34 }
 0x168   :  { %v1007_v49 = vsel %vm1910_vm11, 0, %v1909_v13  ;;  %v1130_v23 = vmul.u32 %v1126_v47, %v3137_v17  ;;  %v1132_v4 = vshll.u32 %v1129_v0, 16  ;;  %v873_v21 = vadd.f32 0.041655596, %v872_v29 }
 0x169   :  { %v1008_v44 = vsub.s32 32, %v1007_v49  ;;  %v1009_v57 = vshll.u32 %v1000_v58, %v1007_v49  ;;  %v1012_v52 = vsub.s32 4294967266, %v1007_v49  ;;  %v881_v2 = vmul.f32 %v880_v19, %v3155_v59  ;;  %v1438_v19 = vld [vmem:[#allocation4 + $0x40] sm:$0xff] }
 0x16a   :  { %v1111_v25 = vshrl.u32 %v1107_v43, 16  ;;  %v1128_v3 = vmul.u32 %v1126_v47, %v3134_v11  ;;  %v1131_v32 = vmul.u32 %v1127_v30, %v3137_v17  ;;  %v1208_v31 = vand.u32 2147483647, %v3866_v62  ;;  %v1439_v47 = vld [vmem:[#allocation4 + $0x48] sm:$0xff] }
 0x16b   :  { %v1010_v50 = vshrl.u32 %v992_v40, %v1008_v44  ;;  %v1013_v53 = vadd.s32 127, %v1012_v52  ;;  %v1134_v5 = vshll.u32 %v1130_v23, 16  ;;  %v3206_v13 = vsel %vm1086_vm9, %v1089_v20, %v1091_v14  ;;  %1454 = vmatpush.msra.mxu1 %v1439_v47  ;;  %v1437_v40 = vld [vmem:[#allocation4 + $0x38] sm:$0xff]  ;;  %v3871_v47 = vld [vmem:[#allocation21_spill] sm:$0xff] }
 0x16c   :  { %v1122_v1 = vadd.s32 %v1121_v45, %v1111_v25  ;;  %vm1136_vm2 = vc.u32 %v1128_v3, %v1132_v4  ;;  %v1138_v56 = vadd.s32 %v1132_v4, %v1128_v3  ;;  %vm900_vm10 = vcmp.lt.s32.totalorder %v3855_v46, 0  ;;  %v1436_v4 = vld [vmem:[#allocation4 + $0x30] sm:$0xff] }
 0x16d   :  { %v1011_v34 = vor.u32 %v1010_v50, %v1009_v57  ;;  %v1014_v58 = vshll.u32 %v1013_v53, 23  ;;  %v1137_v43 = vsel %vm1136_vm2, 1, %v3827_v55  ;;  %v874_v11 = vmul.f32 %v873_v21, %v3155_v59  ;;  %1455 = vmatpush.msra.mxu1 %v1438_v19  ;;  %v3869_v57 = vld [vmem:[#allocation17_spill] sm:$0xff]  ;;  %v3870_v25 = vld [vmem:[#allocation18_spill] sm:$0xff] }
 0x16e   :  { %v1113_v17 = vshrl.u32 %v3151_v12, 16  ;;  %v1139_v30 = vadd.s32 %v1137_v43, %v1131_v32  ;;  %vm1140_vm12 = vc.u32 %v1138_v56, %v1134_v5  ;;  %v882_v6 = vadd.f32 -0.16666654, %v881_v2 }
 0x16f   :  { %vm3214_vm8 = vcmp.le.f32.partialorder %v898_v38, 0.7853982  ;;  %v1015_v33 = vor.u32 4788187, %v1014_v58  ;;  %v1018_v54 = vcvt.s32.f32 %v1011_v34  ;;  %v1141_v29 = vsel %vm1140_vm12, 1, %v3827_v55  ;;  %1456 = vmatpush.msra.mxu1 %v1437_v40  ;;  %v3874_v40 = vld [vmem:[#allocation23_spill] sm:$0xff] }
 0x170   :  { %v3219_v20 = vadd.s32 %v1122_v1, %v1113_v17  ;;  %v1133_v49 = vshrl.u32 %v1129_v0, 16  ;;  %v1143_v12 = vadd.s32 %v1141_v29, %v1139_v30  ;;  %v1215_v14 = vand.u32 8388607, %v1208_v31  ;;  %v3872_v17 = vld [vmem:[#allocation20_spill] sm:$0xff]  ;;  %v3873_v30 = vld [vmem:[#allocation22_spill] sm:$0xff] }
 0x171   :  { %v1016_v45 = vand.u32 2147483647, %v1015_v33  ;;  %v1135_v38 = vshrl.u32 %v1130_v23, 16  ;;  %v3223_v44 = vadd.s32 %v1138_v56, %v1134_v5  ;;  %v1225_v52 = vshll.u32 %v3821_v16, %v3869_v57  ;;  %v1435_v5 = vld [vmem:[#allocation4 + $0x28] sm:$0xff]  ;;  %1457 = vmatpush.msra.mxu1 %v1436_v4  ;;  %v1432_v4 = vld [vmem:[#allocation4 + $0x10] sm:$0xff] }
 0x172   :  { %v1144_v21 = vadd.s32 %v1143_v12, %v1133_v49  ;;  %v1216_v2 = vor.u32 8388608, %v1215_v14  ;;  %v1226_v3 = vshrl.u32 %v3822_v61, %v3870_v25  ;;  %v1228_v0 = vshll.u32 %v3822_v61, %v3869_v57 }
 0x173   :  { %v1019_v50 = vmul.f32 %v1018_v54, %v1016_v45  ;;  %v1229_v53 = vshrl.u32 %v3823_v8, %v3870_v25  ;;  %v1231_v23 = vshll.u32 %v3823_v8, %v3869_v57  ;;  %v1232_v32 = vshrl.u32 %v3824_v22, %v3870_v25  ;;  %v1434_v22 = vld [vmem:[#allocation4 + $0x20] sm:$0xff]  ;;  %1458 = vmatpush.msra.mxu1 %v1435_v5 }
 0x174   :  { %v730_v1 = vmul.f32 %v729_v24, %v3026_v63  ;;  %v1145_v56 = vadd.s32 %v1144_v21, %v1135_v38  ;;  %vm1148_vm13 = vc.u32 %v3219_v20, %v3223_v44  ;;  %v3240_v34 = vor.u32 %v1226_v3, %v1225_v52 }
 0x175   :  { %v1020_v61 = vxor.u32 2147483648, %v1019_v50  ;;  %v3242_v58 = vor.u32 %v1229_v53, %v1228_v0  ;;  %v3244_v43 = vor.u32 %v1232_v32, %v1231_v23  ;;  %vm1242_vm7 = vcmp.lt.s32.totalorder %v3871_v47, 3  ;;  %1459 = vmatpush.msra.mxu1 %v1434_v22  ;;  %v1431_v53 = vld [vmem:[#allocation4 + $0x8] sm:$0xff]  ;;  %v1412_v32 = vpop.f32.mrf.mxu0 }
 0x176   :  { %vm735_vm14 = vcmp.eq.s32.totalorder %v3173_v60, 0  ;;  %vm738_vm1 = vcmp.eq.s32.totalorder %v3173_v60, 2  ;;  %v875_v8 = vadd.f32 -0.4999988, %v874_v11  ;;  %v1146_v63 = vmul.u32 %v3103_v18, %v3206_v13  ;;  %v1433_v13 = vld [vmem:[#allocation4 + $0x18] sm:$0xff] }
 0x177   :  { %v1149_v24 = vadd.s32 1, %v1145_v56  ;;  %v1254_v33 = vsel %vm1242_vm7, %v3873_v30, %v3872_v17  ;;  %v883_v54 = vmul.f32 %v882_v6, %v3155_v59  ;;  %v1021_v29 = vsel %vm900_vm10, %v1020_v61, %v1019_v50  ;;  %1460 = vmatpush.msra.mxu1 %v1433_v13 }
 0x178   :  { %vm1240_vm6 = vcmp.lt.s32.totalorder %v3871_v47, 1  ;;  %v3259_v19 = vshll.u32 %v1216_v2, 8  ;;  %v3264_v18 = vsel %vm3214_vm8, %v3855_v46, %v1021_v29  ;;  %v1250_v49 = vsel %vm1242_vm7, %v3244_v43, %v3874_v40 }
 0x179   :  { %v1150_v11 = vsel %vm1148_vm13, %v1149_v24, %v1145_v56  ;;  %v1248_v6 = vsel %vm1240_vm6, %v3240_v34, %v3242_v58  ;;  %v3279_v12 = vmul.f32 %v3264_v18, %v3264_v18  ;;  %vm1241_vm9 = vcmp.lt.s32.totalorder %v3871_v47, 2  ;;  %1461 = vmatpush.msra.mxu1 %v1432_v4  ;;  %v1430_v24 = vld [vmem:[#allocation4] sm:$0xff] }
 0x17a   :  { %v1151_v14 = vadd.s32 %v1150_v11, %v1146_v63  ;;  %v1252_v45 = vsel %vm1240_vm6, %v3242_v58, %v3244_v43  ;;  %v736_v38 = vxor.u32 2147483648, %v730_v1  ;;  %v739_v57 = vxor.u32 2147483648, %v3187_v39 }
 0x17b   :  { %v887_v52 = vadd.s32 3, %v870_v9  ;;  %v1255_v21 = vsel %vm1241_vm9, %v1252_v45, %v1254_v33  ;;  %vm734_vm5 = vcmp.lt.s32.totalorder %v3173_v60, 2  ;;  %v1034_v2 = vmul.f32 -0.00019511016, %v3279_v12  ;;  %1462 = vmatpush.msra.mxu1 %v1431_v53 }
 0x17c   :  { %v1152_v3 = vadd.s32 536870912, %v1151_v14  ;;  %v3297_v0 = vsel %vm1241_vm9, %v1248_v6, %v1250_v49  ;;  %v1259_v50 = vand.u32 65535, %v1255_v21  ;;  %v1022_v51 = vsub.s32 4, %v3118_v7 }
 0x17d   :  { %v1257_v37 = vand.u32 65535, %v3259_v19  ;;  %v3302_v9 = vshrl.u32 %v3259_v19, 16  ;;  %v1260_v23 = vshrl.u32 %v1255_v21, 16  ;;  %v876_v5 = vmul.f32 %v875_v8, %v3155_v59  ;;  %1463 = vmatpush.msra.mxu1 %v1430_v24 }
 0x17e   :  { %v884_v56 = vadd.f32 1.0, %v883_v54  ;;  %v1035_v61 = vadd.f32 0.008332121, %v1034_v2  ;;  %v3305_v22 = vshrl.u32 %v1152_v3, 30  ;;  %v3308_v63 = vadd.f32 %v1412_v32, %v3176_v35  ;;  %1464 = vmatmul.f32.vlgmr.msra.gmra.mxu1 %v3144_v27 }
 0x17f   :  { %v1262_v17 = vmul.u32 %v1260_v23, %v1257_v37  ;;  %v1263_v30 = vmul.u32 %v1259_v50, %v3302_v9  ;;  %v1282_v33 = vshrl.u32 %v3297_v0, 16  ;;  %v737_v29 = vsel %vm735_vm14, %v3187_v39, %v736_v38 }
 0x180   :  { %v740_v59 = vsel %vm738_vm1, %v739_v57, %v730_v1  ;;  %v3317_v8 = vand.u32 3, %v887_v52  ;;  %v1154_v54 = vshll.u32 %v3305_v22, 30  ;;  %v3323_v35 = vsel %vm900_vm10, %v1022_v51, %v3118_v7 }
 0x181   :  { %v1027_v13 = vmul.f32 -0.001358992, %v3279_v12  ;;  %v1261_v11 = vmul.u32 %v1259_v50, %v1257_v37  ;;  %v1265_v6 = vshll.u32 %v1262_v17, 16  ;;  %v3326_v40 = vadd.f32 1.0, %v876_v5 }
 0x182   :  { %v3329_v39 = vmul.f32 %v884_v56, %v3131_v42  ;;  %v1036_v1 = vmul.f32 %v1035_v61, %v3279_v12  ;;  %v1155_v49 = vsub.s32 %v1151_v14, %v1154_v54  ;;  %v1267_v45 = vshll.u32 %v1263_v30, 16 }
 0x183   :  { %vm1269_vm4 = vc.u32 %v1261_v11, %v1265_v6  ;;  %v1271_v38 = vadd.s32 %v1265_v6, %v1261_v11  ;;  %v3333_v7 = vmul.u32 %v1282_v33, %v1257_v37  ;;  %v1264_v52 = vmul.u32 %v1260_v23, %v3302_v9 }
 0x184   :  { %vm1156_vm0 = vcmp.lt.s32.totalorder %v1155_v49, 0  ;;  %v1157_v57 = vsub.s32 0, %v1155_v49  ;;  %v1281_v4 = vand.u32 65535, %v3297_v0  ;;  %v741_v42 = vsel %vm734_vm5, %v737_v29, %v740_v59 }
 0x185   :  { %v1028_v21 = vadd.f32 0.041655596, %v1027_v13  ;;  %v1270_v2 = vsel %vm1269_vm4, 1, %v3827_v55  ;;  %vm1273_vm3 = vc.u32 %v1271_v38, %v1267_v45  ;;  %v1025_v14 = vsel %vm3214_vm8, 0, %v3323_v35 }
 0x186   :  { %v1037_v3 = vadd.f32 -0.16666654, %v1036_v1  ;;  %v1158_v50 = vsel %vm1156_vm0, %v1157_v57, %v1155_v49  ;;  %v1272_v51 = vadd.s32 %v1270_v2, %v1264_v52  ;;  %v894_v53 = vxor.u32 2147483648, %v3326_v40  ;;  %1467 = vmatmul.f32.gmra.mxu1 %v3147_v48 }
 0x187   :  { %v1159_v32 = vclz %v1158_v50  ;;  %v1274_v23 = vsel %vm1273_vm3, 1, %v3827_v55  ;;  %v1287_v0 = vshll.u32 %v3333_v7, 16  ;;  %v891_v60 = vxor.u32 2147483648, %v3329_v39 }
 0x188   :  { %v1266_v5 = vshrl.u32 %v1262_v17, 16  ;;  %v1276_v56 = vadd.s32 %v1274_v23, %v1272_v51  ;;  %v1285_v61 = vmul.u32 %v1281_v4, %v3302_v9  ;;  %vm731_vm11 = vweird.f32 %v2167_v26 }
 0x189   :  { %v1029_v36 = vmul.f32 %v1028_v21, %v3279_v12  ;;  %v1147_v24 = vadd.s32 %v3223_v44, %v3219_v20  ;;  %v1912_v29 = vadd.s32 4294967294, %v1159_v32  ;;  %v1283_v59 = vmul.u32 %v1281_v4, %v1257_v37 }
 0x18a   :  { %vm890_vm2 = vcmp.eq.s32.totalorder %v3317_v8, 0  ;;  %v1038_v54 = vmul.f32 %v1037_v3, %v3279_v12  ;;  %v1224_v35 = vshrl.u32 %v3821_v16, %v3870_v25  ;;  %v1268_v17 = vshrl.u32 %v1263_v30, 16 }
 0x18b   :  { %v1277_v13 = vadd.s32 %v1276_v56, %v1266_v5  ;;  %vm1913_vm10 = vcmp.lt.s32.totalorder %v1912_v29, 0  ;;  %v1286_v11 = vmul.u32 %v1282_v33, %v3302_v9  ;;  %vm1291_vm12 = vc.u32 %v1283_v59, %v1287_v0 }
 0x18c   :  { %v1293_v6 = vadd.s32 %v1287_v0, %v1283_v59  ;;  %v1162_v1 = vsel %vm1913_vm10, 0, %v1912_v29  ;;  %v1289_v44 = vshll.u32 %v1285_v61, 16  ;;  %v1292_v37 = vsel %vm1291_vm12, 1, %v3827_v55 }
 0x18d   :  { %v1278_v20 = vadd.s32 %v1277_v13, %v1268_v17  ;;  %v1030_v45 = vadd.f32 -0.4999988, %v1029_v36  ;;  %v1163_v38 = vsub.s32 32, %v1162_v1  ;;  %v1167_v57 = vsub.s32 4294967266, %v1162_v1 }
 0x18e   :  { %v1245_v16 = vsel %vm1243_vm15, %v3244_v43, 2102212464  ;;  %v1039_v25 = vadd.f32 1.0, %v1038_v54  ;;  %v1294_v30 = vadd.s32 %v1292_v37, %v1286_v11  ;;  %vm1295_vm8 = vc.u32 %v1293_v6, %v1289_v44  ;;  %1470 = vmatmul.f32.gmra.mxu1 %v3308_v63 }
 0x18f   :  { %v1297_v52 = vadd.s32 %v1293_v6, %v1289_v44  ;;  %v1164_v4 = vshll.u32 %v1155_v49, %v1162_v1  ;;  %v1165_v9 = vshrl.u32 %v1147_v24, %v1163_v38  ;;  %v1168_v33 = vadd.s32 127, %v1167_v57 }
 0x190   :  { %v1296_v21 = vsel %vm1295_vm8, 1, %v3827_v55  ;;  %v1288_v2 = vshrl.u32 %v3333_v7, 16  ;;  %v1244_v43 = vsel %vm1240_vm6, %v1224_v35, %v3240_v34  ;;  %v1246_v49 = vsel %vm1242_vm7, %v3242_v58, %v1245_v16  ;;  %v1415_v55 = vpop.f32.mrf.mxu0 }
 0x191   :  { %v1298_v3 = vadd.s32 %v1296_v21, %v1294_v30  ;;  %v3364_v50 = vadd.s32 %v1297_v52, %v1278_v20  ;;  %vm1303_vm13 = vc.u32 %v1278_v20, %v1297_v52  ;;  %v1166_v51 = vor.u32 %v1165_v9, %v1164_v4 }
 0x192   :  { %v1169_v32 = vshll.u32 %v1168_v33, 23  ;;  %v742_v23 = vsel %vm731_vm11, nan, %v741_v42  ;;  %v1031_v7 = vmul.f32 %v1030_v45, %v3279_v12  ;;  %v1290_v0 = vshrl.u32 %v1285_v61, 16 }
 0x193   :  { %v1299_v5 = vadd.s32 %v1298_v3, %v1288_v2  ;;  %vm889_vm15 = vcmp.lt.s32.totalorder %v3317_v8, 2  ;;  %v892_v56 = vsel %vm890_vm2, %v3326_v40, %v891_v60  ;;  %v1042_v36 = vadd.s32 3, %v1025_v14 }
 0x194   :  { %v1170_v34 = vor.u32 4788187, %v1169_v32  ;;  %vm893_vm7 = vcmp.eq.s32.totalorder %v3317_v8, 2  ;;  %v1040_v26 = vmul.f32 %v1039_v25, %v3264_v18  ;;  %v1247_v58 = vsel %vm1241_vm9, %v1244_v43, %v1246_v49 }
 0x195   :  { %v1300_v12 = vadd.s32 %v1299_v5, %v1290_v0  ;;  %v1384_v42 = vadd.f32 %v2982_v41, %v742_v23  ;;  %v895_v61 = vsel %vm893_vm7, %v894_v53, %v3329_v39  ;;  %v1173_v60 = vcvt.s32.f32 %v1166_v51 }
 0x196   :  { %v1171_v24 = vand.u32 2147483647, %v1170_v34  ;;  %v896_v14 = vsel %vm889_vm15, %v892_v56, %v895_v61  ;;  %v1032_v29 = vadd.f32 1.0, %v1031_v7  ;;  %v1043_v54 = vand.u32 3, %v1042_v36 }
 0x197   :  { %v1304_v59 = vadd.s32 1, %v1300_v12  ;;  %v1301_v8 = vmul.u32 %v3259_v19, %v1247_v58  ;;  %vm886_vm14 = vweird.f32 %v3846_v10  ;;  %v1046_v47 = vxor.u32 2147483648, %v1040_v26 }
 0x198   :  { %v1174_v35 = vmul.f32 %v1173_v60, %v1171_v24  ;;  %v3391_v17 = vadd.f32 %v1415_v55, %v1384_v42  ;;  %v897_v13 = vsel %vm886_vm14, nan, %v896_v14  ;;  %vm1055_vm1 = vcmp.lt.s32.totalorder %v2427_v15, 0  ;;  %v1418_v20 = vpop.f32.mrf.mxu0 }
 0x199   :  { %v1305_v18 = vsel %vm1303_vm13, %v1304_v59, %v1300_v12  ;;  %v1049_v39 = vxor.u32 2147483648, %v1032_v29  ;;  %v1177_v53 = vsub.s32 4, %v3305_v22  ;;  %vm1045_vm6 = vcmp.eq.s32.totalorder %v1043_v54, 0 }
 0x19a   :  { %v1175_v11 = vxor.u32 2147483648, %v1174_v35  ;;  %v1306_v40 = vadd.s32 %v1305_v18, %v1301_v8  ;;  %vm3397_vm9 = vcmp.le.f32.partialorder %v1053_v28, 0.7853982  ;;  %1473 = vmatmul.f32.gmra.mxu1 %v3391_v17  ;;  %v1385_v1 = vadd.f32 %v2982_v41, %v897_v13 }
 0x19b   :  { %v1047_v44 = vsel %vm1045_vm6, %v1032_v29, %v1046_v47  ;;  %vm1048_vm5 = vcmp.eq.s32.totalorder %v1043_v54, 2  ;;  %vm1044_vm4 = vcmp.lt.s32.totalorder %v1043_v54, 2  ;;  %v1178_v57 = vsel %vm1055_vm1, %v1177_v53, %v3305_v22 }
 0x19c   :  { %v1176_v10 = vsel %vm1055_vm1, %v1175_v11, %v1174_v35  ;;  %v1307_v6 = vadd.s32 536870912, %v1306_v40  ;;  %v1050_v38 = vsel %vm1048_vm5, %v1049_v39, %v1040_v26  ;;  %v3414_v4 = vadd.f32 %v1418_v20, %v1385_v1 }
 0x19d   :  { %v1179_v37 = vsel %vm3397_vm9, %v2427_v15, %v1176_v10  ;;  %v1051_v16 = vsel %vm1044_vm4, %v1047_v44, %v1050_v38  ;;  %vm1041_vm0 = vweird.f32 %v3855_v46  ;;  %v1180_v9 = vsel %vm3397_vm9, 0, %v1178_v57 }
 0x19e   :  { %v1181_v45 = vmul.f32 %v1179_v37, %v1179_v37  ;;  %v3408_v28 = vshrl.u32 %v1307_v6, 30  ;;  %v1052_v3 = vsel %vm1041_vm0, nan, %v1051_v16  ;;  %v1197_v43 = vadd.s32 3, %v1180_v9 }
 0x19f   :  { %v1386_v49 = vadd.f32 %v2982_v41, %v1052_v3  ;;  %vm1196_vm8 = vweird.f32 %v2427_v15  ;;  %vm1210_vm13 = vcmp.lt.s32.totalorder %v3866_v62, 0  ;;  %vm1209_vm15 = vcmp.le.f32.partialorder %v1208_v31, 0.7853982 }
 0x1a0   :  { %v1182_v25 = vmul.f32 -0.001358992, %v1181_v45  ;;  %v1189_v30 = vmul.f32 -0.00019511016, %v1181_v45  ;;  %v1309_v52 = vshll.u32 %v3408_v28, 30  ;;  %v1421_v46 = vpop.f32.mrf.mxu0  ;;  %v1198_v12 = vand.u32 3, %v1197_v43 }
 0x1a1   :  { %v3421_v34 = vadd.f32 %v1421_v46, %v1386_v49  ;;  %v1332_v15 = vsub.s32 4, %v3408_v28  ;;  %vm1351_vm6 = vweird.f32 %v3866_v62 }
 0x1a2   :  { %v1183_v33 = vadd.f32 0.041655596, %v1182_v25  ;;  %v1190_v21 = vadd.f32 0.008332121, %v1189_v30  ;;  %v1310_v2 = vsub.s32 %v1306_v40, %v1309_v52  ;;  %1476 = vmatmul.f32.gmra.mxu1 %v3414_v4  ;;  %vm1200_vm2 = vcmp.eq.s32.totalorder %v1198_v12, 0 }
 0x1a3   :  { %vm1203_vm10 = vcmp.eq.s32.totalorder %v1198_v12, 2  ;;  %vm1199_vm12 = vcmp.lt.s32.totalorder %v1198_v12, 2 }
 0x1a4   :  { %v1184_v51 = vmul.f32 %v1183_v33, %v1181_v45  ;;  %v1191_v32 = vmul.f32 %v1190_v21, %v1181_v45  ;;  %vm1311_vm3 = vcmp.lt.s32.totalorder %v1310_v2, 0  ;;  %v1312_v22 = vsub.s32 0, %v1310_v2 }
 0x1a6   :  { %v1185_v23 = vadd.f32 -0.4999988, %v1184_v51  ;;  %v1192_v55 = vadd.f32 -0.16666654, %v1191_v32  ;;  %v1313_v7 = vsel %vm1311_vm3, %v1312_v22, %v1310_v2 }
 0x1a7   :  { %v1314_v0 = vclz %v1313_v7 }
 0x1a8   :  { %v1186_v5 = vmul.f32 %v1185_v23, %v1181_v45  ;;  %v1193_v56 = vmul.f32 %v1192_v55, %v1181_v45  ;;  %v1424_v19 = vpop.f32.mrf.mxu0  ;;  %v1333_v45 = vsel %vm1210_vm13, %v1332_v15, %v3408_v28 }
 0x1a9   :  { %v1915_v36 = vadd.s32 4294967294, %v1314_v0  ;;  %v1335_v16 = vsel %vm1209_vm15, 0, %v1333_v45  ;;  %v1756_v45 = vld [vmem:[%s3762_s4 + $0x18] sm:$0xff] }
 0x1aa   :  { %v1187_v26 = vadd.f32 1.0, %v1186_v5  ;;  %v1194_v58 = vadd.f32 1.0, %v1193_v56  ;;  %1479 = vmatmul.f32.gmra.mxu1 %v3421_v34  ;;  %v1352_v33 = vadd.s32 3, %v1335_v16  ;;  %v1962_v5 = vld [vmem:[%s3759_s1 + $0x2] ss:$0 sm:$0xff] }
 0x1ab   :  { %vm1916_vm11 = vcmp.lt.s32.totalorder %v1915_v36, 0 }
 0x1ac   :  { %v1195_v42 = vmul.f32 %v1194_v58, %v1179_v37  ;;  %v1204_v61 = vxor.u32 2147483648, %v1187_v26  ;;  %v1317_v24 = vsel %vm1916_vm11, 0, %v1915_v36  ;;  %v1353_v32 = vand.u32 3, %v1352_v33  ;;  %v1753_v33 = vld [vmem:[%s3762_s4] sm:$0xff] }
 0x1ad   :  { %v1318_v60 = vsub.s32 32, %v1317_v24  ;;  %v1322_v14 = vsub.s32 4294967266, %v1317_v24  ;;  %v1319_v59 = vshll.u32 %v1310_v2, %v1317_v24 }
 0x1ae   :  { %v1201_v29 = vxor.u32 2147483648, %v1195_v42  ;;  %v1205_v47 = vsel %vm1203_vm10, %v1204_v61, %v1195_v42  ;;  %vm1358_vm7 = vcmp.eq.s32.totalorder %v1353_v32, 2  ;;  %vm1355_vm14 = vcmp.eq.s32.totalorder %v1353_v32, 0  ;;  %v1768_v42 = vld [vmem:[%s3762_s4 + $0x78] sm:$0xff]  ;;  %v1767_v61 = vld [vmem:[%s3762_s4 + $0x70] sm:$0xff] }
 0x1af   :  { %v1320_v54 = vshrl.u32 %v3364_v50, %v1318_v60  ;;  %v1323_v35 = vadd.s32 127, %v1322_v14  ;;  %vm1354_vm1 = vcmp.lt.s32.totalorder %v1353_v32, 2  ;;  %1771 = vmatpush.msra.mxu2 %v1768_v42 }
 0x1b0   :  { %v1202_v8 = vsel %vm1200_vm2, %v1187_v26, %v1201_v29  ;;  %v1427_v0 = vpop.f32.mrf.mxu0  ;;  %v3446_v26 = vld [vmem:[%s3759_s1 + $0x3] ss:$0 sm:$0xff] }
 0x1b1   :  { %v1206_v18 = vsel %vm1199_vm12, %v1202_v8, %v1205_v47  ;;  %v1321_v13 = vor.u32 %v1320_v54, %v1319_v59  ;;  %v1324_v11 = vshll.u32 %v1323_v35, 23  ;;  %1772 = vmatpush.msra.mxu2 %v1767_v61  ;;  %v1766_v59 = vld [vmem:[%s3762_s4 + $0x68] sm:$0xff]  ;;  %v1765_v54 = vld [vmem:[%s3762_s4 + $0x60] sm:$0xff]  ;;  %v1764_v8 = vld [vmem:[%s3762_s4 + $0x58] sm:$0xff] }
 0x1b2   :  { %v1207_v40 = vsel %vm1196_vm8, nan, %v1206_v18  ;;  %v1763_v18 = vld [vmem:[%s3762_s4 + $0x50] sm:$0xff] }
 0x1b3   :  { %v1387_v39 = vadd.f32 %v2982_v41, %v1207_v40  ;;  %v1325_v53 = vor.u32 4788187, %v1324_v11  ;;  %v1328_v1 = vcvt.s32.f32 %v1321_v13  ;;  %1773 = vmatpush.msra.mxu2 %v1766_v59  ;;  %v1762_v40 = vld [vmem:[%s3762_s4 + $0x48] sm:$0xff] }
 0x1b5   :  { %v3427_v10 = vadd.f32 %v1424_v19, %v1387_v39  ;;  %v1326_v6 = vand.u32 2147483647, %v1325_v53  ;;  %1774 = vmatpush.msra.mxu2 %v1765_v54  ;;  %v1761_v39 = vld [vmem:[%s3762_s4 + $0x40] sm:$0xff]  ;;  %v1760_v19 = vld [vmem:[%s3762_s4 + $0x38] sm:$0xff] }
 0x1b7   :  { %v1329_v20 = vmul.f32 %v1328_v1, %v1326_v6  ;;  %1482 = vmatmul.f32.gmra.mxu1 %v3427_v10  ;;  %1775 = vmatpush.msra.mxu2 %v1764_v8 }
 0x1b9   :  { %v1330_v50 = vxor.u32 2147483648, %v1329_v20  ;;  %1776 = vmatpush.msra.mxu2 %v1763_v18 }
 0x1bb   :  { %v1331_v44 = vsel %vm1210_vm13, %v1330_v50, %v1329_v20  ;;  %1777 = vmatpush.msra.mxu2 %v1762_v40  ;;  %v1759_v20 = vld [vmem:[%s3762_s4 + $0x30] sm:$0xff] }
 0x1bc   :  { %v1334_v41 = vsel %vm1209_vm15, %v3866_v62, %v1331_v44  ;;  %v1758_v44 = vld [vmem:[%s3762_s4 + $0x28] sm:$0xff] }
 0x1bd   :  { %v1336_v37 = vmul.f32 %v1334_v41, %v1334_v41  ;;  %1778 = vmatpush.msra.mxu2 %v1761_v39 }
 0x1bf   :  { %v1337_v38 = vmul.f32 -0.001358992, %v1336_v37  ;;  %v1344_v57 = vmul.f32 -0.00019511016, %v1336_v37  ;;  %1779 = vmatpush.msra.mxu2 %v1760_v19 }
 0x1c1   :  { %v1338_v25 = vadd.f32 0.041655596, %v1337_v38  ;;  %v1345_v30 = vadd.f32 0.008332121, %v1344_v57  ;;  %1780 = vmatpush.msra.mxu2 %v1759_v20  ;;  %v1755_v57 = vld [vmem:[%s3762_s4 + $0x10] sm:$0xff] }
 0x1c3   :  { %v1339_v52 = vmul.f32 %v1338_v25, %v1336_v37  ;;  %v1346_v9 = vmul.f32 %v1345_v30, %v1336_v37  ;;  %1781 = vmatpush.msra.mxu2 %v1758_v44 }
 0x1c5   :  { %v1340_v21 = vadd.f32 -0.4999988, %v1339_v52  ;;  %v1347_v2 = vadd.f32 -0.16666654, %v1346_v9  ;;  %v1754_v52 = vld [vmem:[%s3762_s4 + $0x8] sm:$0xff] }
 0x1c7   :  { %v1341_v3 = vmul.f32 %v1340_v21, %v1336_v37  ;;  %v1348_v51 = vmul.f32 %v1347_v2, %v1336_v37 }
 0x1c9   :  { %v1342_v31 = vadd.f32 1.0, %v1341_v3  ;;  %v1349_v22 = vadd.f32 1.0, %v1348_v51 }
 0x1cb   :  { %v1350_v43 = vmul.f32 %v1349_v22, %v1334_v41  ;;  %v1359_v49 = vxor.u32 2147483648, %v1342_v31  ;;  %v1757_v41 = vld [vmem:[%s3762_s4 + $0x20] sm:$0xff] }
 0x1cc   :  { %1782 = vmatpush.msra.mxu2 %v1757_v41 }
 0x1cd   :  { %v1356_v23 = vxor.u32 2147483648, %v1350_v43  ;;  %v1360_v28 = vsel %vm1358_vm7, %v1359_v49, %v1350_v43 }
 0x1ce   :  { %1783 = vmatpush.msra.mxu2 %v1756_v45 }
 0x1cf   :  { %v1357_v55 = vsel %vm1355_vm14, %v1342_v31, %v1356_v23 }
 0x1d0   :  { %v1361_v7 = vsel %vm1354_vm1, %v1357_v55, %v1360_v28  ;;  %1784 = vmatpush.msra.mxu2 %v1755_v57 }
 0x1d1   :  { %v1362_v46 = vsel %vm1351_vm6, nan, %v1361_v7 }
 0x1d2   :  { %v1388_v56 = vadd.f32 %v1962_v5, %v1362_v46  ;;  %1785 = vmatpush.msra.mxu2 %v1754_v52 }
 0x1d4   :  { %v3440_v36 = vadd.f32 %v1427_v0, %v1388_v56  ;;  %1786 = vmatpush.msra.mxu2 %v1753_v33 }
 0x1d6   :  { %1485 = vmatmul.f32.gmra.mxu1 %v3440_v36 }
 0x1fb   :  { %v1465_v58 = vpop.f32.mrf.mxu1 }
 0x1fc   :  { %v3449_v62 = vadd.f32 %v3446_v26, %v1465_v58 }
 0x1fe   :  { %v1497_v12 = vmul.f32 0.70710677, %v3449_v62 }
 0x200   :  { %v3458_v24 = vclamps-f32 %v1497_v12, 4.0 }
 0x202   :  { %v3465_v29 = vmul.f32 %v3458_v24, %v3458_v24 }
 0x203   :  { %v1468_v60 = vpop.f32.mrf.mxu1 }
 0x204   :  { %v3461_v14 = vadd.f32 %v3446_v26, %v1468_v60  ;;  %v1529_v47 = vmul.f32 -2.7261424e-10, %v3465_v29  ;;  %v1633_v9 = vmul.f32 -1.45660715e-05, %v3465_v29 }
 0x206   :  { %v1498_v35 = vmul.f32 0.70710677, %v3461_v14  ;;  %v1537_v11 = vadd.f32 2.7706815e-08, %v1529_v47  ;;  %v1641_v3 = vadd.f32 -0.00021337405, %v1633_v9 }
 0x208   :  { %v3481_v13 = vclamps-f32 %v1498_v35, 4.0  ;;  %v1545_v6 = vmul.f32 %v1537_v11, %v3465_v29  ;;  %v1649_v32 = vmul.f32 %v1641_v3, %v3465_v29 }
 0x20a   :  { %v3491_v53 = vmul.f32 %v3481_v13, %v3481_v13  ;;  %v1553_v15 = vadd.f32 -2.101024e-06, %v1545_v6  ;;  %v1657_v49 = vadd.f32 -0.001682827, %v1649_v32 }
 0x20b   :  { %v1471_v1 = vpop.f32.mrf.mxu1 }
 0x20c   :  { %v1530_v50 = vmul.f32 -2.7261424e-10, %v3491_v53  ;;  %v1561_v38 = vmul.f32 %v1553_v15, %v3465_v29  ;;  %v3523_v21 = vadd.f32 %v3446_v26, %v1471_v1  ;;  %v1665_v55 = vmul.f32 %v1657_v49, %v3465_v29 }
 0x20d   :  { %v1634_v56 = vmul.f32 -1.45660715e-05, %v3491_v53 }
 0x20e   :  { %v1538_v37 = vadd.f32 2.7706815e-08, %v1530_v50  ;;  %v1569_v30 = vadd.f32 -5.6925062e-05, %v1561_v38  ;;  %v1499_v31 = vmul.f32 0.70710677, %v3523_v21 }
 0x20f   :  { %v1673_v5 = vadd.f32 -0.0073733293, %v1665_v55  ;;  %v1642_v60 = vadd.f32 -0.00021337405, %v1634_v56 }
 0x210   :  { %v1546_v16 = vmul.f32 %v1538_v37, %v3491_v53  ;;  %v1577_v51 = vmul.f32 %v1569_v30, %v3465_v29  ;;  %v3533_v7 = vclamps-f32 %v1499_v31, 4.0 }
 0x211   :  { %v1681_v12 = vmul.f32 %v1673_v5, %v3465_v29  ;;  %v1650_v47 = vmul.f32 %v1642_v60, %v3491_v53 }
 0x212   :  { %v1554_v2 = vadd.f32 -2.101024e-06, %v1546_v16  ;;  %v1585_v23 = vadd.f32 -0.00073499064, %v1577_v51  ;;  %v3547_v54 = vmul.f32 %v3533_v7, %v3533_v7 }
 0x213   :  { %v1689_v35 = vadd.f32 -0.014264739, %v1681_v12  ;;  %v1658_v40 = vadd.f32 -0.001682827, %v1650_v47 }
 0x214   :  { %v1562_v43 = vmul.f32 %v1554_v2, %v3491_v53  ;;  %v1593_v58 = vmul.f32 %v1585_v23, %v3465_v29  ;;  %v1531_v19 = vmul.f32 -2.7261424e-10, %v3547_v54 }
 0x215   :  { %1946 = vrcp.f32 %v1689_v35  ;;  %v1666_v20 = vmul.f32 %v1658_v40, %v3491_v53 }
 0x216   :  { %v1570_v0 = vadd.f32 -5.6925062e-05, %v1562_v43  ;;  %v1601_v8 = vadd.f32 -0.0029546, %v1593_v58  ;;  %v1539_v45 = vadd.f32 2.7706815e-08, %v1531_v19 }
 0x217   :  { %v1474_v25 = vpop.f32.mrf.mxu1  ;;  %v1674_v44 = vadd.f32 -0.0073733293, %v1666_v20 }
 0x218   :  { %v3529_v22 = vadd.f32 %v3446_v26, %v1474_v25  ;;  %v1578_v59 = vmul.f32 %v1570_v0, %v3491_v53  ;;  %v1609_v1 = vmul.f32 %v1601_v8, %v3465_v29  ;;  %v1547_v2 = vmul.f32 %v1539_v45, %v3547_v54 }
 0x219   :  { %v1682_v25 = vmul.f32 %v1674_v44, %v3491_v53 }
 0x21a   :  { %v1500_v46 = vmul.f32 0.70710677, %v3529_v22  ;;  %v1586_v39 = vadd.f32 -0.00073499064, %v1578_v59  ;;  %v1617_v38 = vadd.f32 -0.016096033, %v1609_v1 }
 0x21b   :  { %v1947_v41 = vpop.eup %1946  ;;  %v1690_v9 = vadd.f32 -0.014264739, %v1682_v25  ;;  %v1555_v55 = vadd.f32 -2.101024e-06, %v1547_v2 }
 0x21c   :  { %v3539_v42 = vclamps-f32 %v1500_v46, 4.0  ;;  %v1594_v37 = vmul.f32 %v1586_v39, %v3491_v53  ;;  %v1705_v16 = vmul.f32 %v1947_v41, %v1689_v35  ;;  %v1625_v3 = vmul.f32 %v3458_v24, %v1617_v38 }
 0x21d   :  { %1948 = vrcp.f32 %v1690_v9  ;;  %v1489_v46 = vmul.f32 0.5, %v3449_v62  ;;  %v1563_v35 = vmul.f32 %v1555_v55, %v3547_v54  ;;  %v1635_v38 = vmul.f32 -1.45660715e-05, %v3547_v54 }
 0x21e   :  { %v3552_v18 = vmul.f32 %v3539_v42, %v3539_v42  ;;  %v1713_v52 = vsub.f32 2.0, %v1705_v16  ;;  %v1602_v33 = vadd.f32 -0.0029546, %v1594_v37  ;;  %v1490_v16 = vmul.f32 0.5, %v3461_v14 }
 0x21f   :  { %v1477_v28 = vpop.f32.mrf.mxu1  ;;  %v1571_v19 = vadd.f32 -5.6925062e-05, %v1563_v35 }
 0x220   :  { %v3542_v61 = vadd.f32 %v3446_v26, %v1477_v28  ;;  %v1532_v50 = vmul.f32 -2.7261424e-10, %v3552_v18  ;;  %v1721_v32 = vmul.f32 %v1947_v41, %v1713_v52  ;;  %v1610_v28 = vmul.f32 %v1602_v33, %v3491_v53 }
 0x221   :  { %v1579_v25 = vmul.f32 %v1571_v19, %v3547_v54  ;;  %v1643_v33 = vadd.f32 -0.00021337405, %v1635_v38 }
 0x222   :  { %v1501_v11 = vmul.f32 0.70710677, %v3542_v61  ;;  %v1540_v30 = vadd.f32 2.7706815e-08, %v1532_v50  ;;  %v1729_v23 = vmul.f32 %v1721_v32, %v1625_v3  ;;  %v1618_v59 = vadd.f32 -0.016096033, %v1610_v28 }
 0x223   :  { %v1949_v56 = vpop.eup %1948  ;;  %v1636_v3 = vmul.f32 -1.45660715e-05, %v3552_v18  ;;  %v1651_v14 = vmul.f32 %v1643_v33, %v3547_v54  ;;  %v1587_v32 = vadd.f32 -0.00073499064, %v1579_v25 }
 0x224   :  { %v3559_v15 = vclamps-f32 %v1501_v11, 4.0  ;;  %v1548_v43 = vmul.f32 %v1540_v30, %v3552_v18  ;;  %v1737_v5 = vadd.f32 1.0, %v1729_v23  ;;  %v1706_v8 = vmul.f32 %v1949_v56, %v1690_v9 }
 0x225   :  { %v1626_v39 = vmul.f32 %v3481_v13, %v1618_v59  ;;  %v1659_v28 = vadd.f32 -0.001682827, %v1651_v14 }
 0x226   :  { %v3568_v29 = vmul.f32 %v3559_v15, %v3559_v15  ;;  %v1556_v58 = vadd.f32 -2.101024e-06, %v1548_v43  ;;  %v1745_v60 = vmul.f32 %v1737_v5, %v1489_v46  ;;  %v1714_v47 = vsub.f32 2.0, %v1706_v8 }
 0x227   :  { %v1480_v6 = vpop.f32.mrf.mxu1 }
 0x228   :  { %v3563_v57 = vadd.f32 %v3446_v26, %v1480_v6  ;;  %v1533_v49 = vmul.f32 -2.7261424e-10, %v3568_v29  ;;  %1787 = vmatmul.f32.vlgmr.msra.gmra.mxu2 %v1745_v60  ;;  %v1564_v11 = vmul.f32 %v1556_v58, %v3552_v18  ;;  %v1722_v6 = vmul.f32 %v1949_v56, %v1714_v47 }
 0x229   :  { %v1667_v56 = vmul.f32 %v1659_v28, %v3547_v54  ;;  %v1595_v58 = vmul.f32 %v1587_v32, %v3547_v54  ;;  %v1637_v47 = vmul.f32 -1.45660715e-05, %v3568_v29 }
 0x22a   :  { %v1502_v51 = vmul.f32 0.70710677, %v3563_v57  ;;  %v1541_v12 = vadd.f32 2.7706815e-08, %v1533_v49  ;;  %v1730_v50 = vmul.f32 %v1722_v6, %v1626_v39  ;;  %v1572_v41 = vadd.f32 -5.6925062e-05, %v1564_v11 }
 0x22b   :  { %v1675_v8 = vadd.f32 -0.0073733293, %v1667_v56  ;;  %v1603_v19 = vadd.f32 -0.0029546, %v1595_v58 }
 0x22c   :  { %v3577_v0 = vclamps-f32 %v1502_v51, 4.0  ;;  %v1549_v40 = vmul.f32 %v1541_v12, %v3568_v29  ;;  %v1738_v13 = vadd.f32 1.0, %v1730_v50 }
 0x22d   :  { %v1683_v39 = vmul.f32 %v1675_v8, %v3547_v54 }
 0x22e   :  { %v3585_v53 = vmul.f32 %v3577_v0, %v3577_v0  ;;  %v1557_v37 = vadd.f32 -2.101024e-06, %v1549_v40  ;;  %v1746_v2 = vmul.f32 %v1738_v13, %v1490_v16 }
 0x230   :  { %v1534_v1 = vmul.f32 -2.7261424e-10, %v3585_v53  ;;  %v1565_v51 = vmul.f32 %v1557_v37, %v3568_v29  ;;  %1790 = vmatmul.f32.gmra.mxu2 %v1746_v2  ;;  %v1691_v37 = vadd.f32 -0.014264739, %v1683_v39  ;;  %v1638_v14 = vmul.f32 -1.45660715e-05, %v3585_v53 }
 0x232   :  { %v1542_v30 = vadd.f32 2.7706815e-08, %v1534_v1  ;;  %v1573_v5 = vadd.f32 -5.6925062e-05, %v1565_v51  ;;  %v1645_v1 = vadd.f32 -0.00021337405, %v1637_v47  ;;  %1950 = vrcp.f32 %v1691_v37 }
 0x233   :  { %v1646_v28 = vadd.f32 -0.00021337405, %v1638_v14 }
 0x234   :  { %v1483_v31 = vpop.f32.mrf.mxu1  ;;  %v1550_v43 = vmul.f32 %v1542_v30, %v3585_v53  ;;  %v1581_v40 = vmul.f32 %v1573_v5, %v3568_v29  ;;  %v1653_v16 = vmul.f32 %v1645_v1, %v3568_v29  ;;  %v1611_v30 = vmul.f32 %v1603_v19, %v3547_v54 }
 0x235   :  { %v3580_v24 = vadd.f32 %v3446_v26, %v1483_v31  ;;  %v1644_v31 = vadd.f32 -0.00021337405, %v1636_v3 }
 0x236   :  { %v1558_v60 = vadd.f32 -2.101024e-06, %v1550_v43  ;;  %v1589_v13 = vadd.f32 -0.00073499064, %v1581_v40  ;;  %v1661_v33 = vadd.f32 -0.001682827, %v1653_v16 }
 0x237   :  { %v1503_v62 = vmul.f32 0.70710677, %v3580_v24  ;;  %v1652_v55 = vmul.f32 %v1644_v31, %v3552_v18  ;;  %v1619_v43 = vadd.f32 -0.016096033, %v1611_v30 }
 0x238   :  { %v1566_v50 = vmul.f32 %v1558_v60, %v3585_v53  ;;  %v1669_v51 = vmul.f32 %v1661_v33, %v3568_v29  ;;  %v1597_v31 = vmul.f32 %v1589_v13, %v3568_v29 }
 0x239   :  { %v3592_v20 = vclamps-f32 %v1503_v62, 4.0  ;;  %v1660_v12 = vadd.f32 -0.001682827, %v1652_v55  ;;  %v1951_v55 = vpop.eup %1950  ;;  %v1627_v8 = vmul.f32 %v3533_v7, %v1619_v43 }
 0x23a   :  { %v1574_v2 = vadd.f32 -5.6925062e-05, %v1566_v50  ;;  %v1707_v56 = vmul.f32 %v1951_v55, %v1691_v37 }
 0x23b   :  { %v3602_v52 = vmul.f32 %v3592_v20, %v3592_v20  ;;  %v1668_v62 = vmul.f32 %v1660_v12, %v3552_v18  ;;  %v1654_v12 = vmul.f32 %v1646_v28, %v3585_v53 }
 0x23c   :  { %v1582_v54 = vmul.f32 %v1574_v2, %v3585_v53  ;;  %v1491_v2 = vmul.f32 0.5, %v3523_v21 }
 0x23d   :  { %v1535_v49 = vmul.f32 -2.7261424e-10, %v3602_v52  ;;  %v1676_v6 = vadd.f32 -0.0073733293, %v1668_v62  ;;  %v1715_v62 = vsub.f32 2.0, %v1707_v56 }
 0x23e   :  { %v1590_v40 = vadd.f32 -0.00073499064, %v1582_v54 }
 0x23f   :  { %v1543_v59 = vadd.f32 2.7706815e-08, %v1535_v49  ;;  %v1684_v38 = vmul.f32 %v1676_v6, %v3552_v18  ;;  %v1677_v49 = vadd.f32 -0.0073733293, %v1669_v51  ;;  %v1723_v1 = vmul.f32 %v1951_v55, %v1715_v62 }
 0x240   :  { %v1598_v13 = vmul.f32 %v1590_v40, %v3585_v53 }
 0x241   :  { %v1685_v58 = vmul.f32 %v1677_v49, %v3568_v29  ;;  %v1731_v16 = vmul.f32 %v1723_v1, %v1627_v8 }
 0x242   :  { %v1606_v49 = vadd.f32 -0.0029546, %v1598_v13 }
 0x243   :  { %v1693_v47 = vadd.f32 -0.014264739, %v1685_v58  ;;  %v1492_v58 = vmul.f32 0.5, %v3529_v22 }
 0x253   :  { %v1486_v44 = vpop.f32.mrf.mxu1 }
 0x254   :  { %v3595_v45 = vadd.f32 %v3446_v26, %v1486_v44  ;;  %v1580_v26 = vmul.f32 %v1572_v41, %v3552_v18  ;;  %v1551_v44 = vmul.f32 %v1543_v59, %v3602_v52  ;;  %v1605_v59 = vadd.f32 -0.0029546, %v1597_v31 }
 0x256   :  { %v1504_v9 = vmul.f32 0.70710677, %v3595_v45  ;;  %v1588_v46 = vadd.f32 -0.00073499064, %v1580_v26  ;;  %v1559_v3 = vadd.f32 -2.101024e-06, %v1551_v44 }
 0x257   :  { %v1639_v44 = vmul.f32 -1.45660715e-05, %v3602_v52 }
 0x258   :  { %v3611_v23 = vclamps-f32 %v1504_v9, 4.0  ;;  %v1596_v11 = vmul.f32 %v1588_v46, %v3552_v18  ;;  %v1692_v9 = vadd.f32 -0.014264739, %v1684_v38  ;;  %v1567_v46 = vmul.f32 %v1559_v3, %v3602_v52 }
 0x259   :  { %v1613_v38 = vmul.f32 %v1605_v59, %v3568_v29  ;;  %v1739_v3 = vadd.f32 1.0, %v1731_v16  ;;  %v1834_v16 = vld [vmem:[%s3763_s5 + $0x70] sm:$0xff] }
 0x25a   :  { %v3618_v35 = vmul.f32 %v3611_v23, %v3611_v23  ;;  %v1604_v25 = vadd.f32 -0.0029546, %v1596_v11  ;;  %1952 = vrcp.f32 %v1692_v9  ;;  %v1662_v11 = vadd.f32 -0.001682827, %v1654_v12 }
 0x25b   :  { %v1575_v39 = vadd.f32 -5.6925062e-05, %v1567_v46  ;;  %1954 = vrcp.f32 %v1693_v47  ;;  %v1621_v29 = vadd.f32 -0.016096033, %v1613_v38  ;;  %v1835_v38 = vld [vmem:[%s3763_s5 + $0x78] sm:$0xff] }
 0x25c   :  { %v1536_v41 = vmul.f32 -2.7261424e-10, %v3618_v35  ;;  %v1612_v32 = vmul.f32 %v1604_v25, %v3552_v18  ;;  %v1670_v50 = vmul.f32 %v1662_v11, %v3585_v53  ;;  %v1647_v25 = vadd.f32 -0.00021337405, %v1639_v44  ;;  %1838 = vmatpush.msra.mxu3 %v1835_v38 }
 0x25d   :  { %v1583_v30 = vmul.f32 %v1575_v39, %v3602_v52  ;;  %v1629_v12 = vmul.f32 %v3559_v15, %v1621_v29 }
 0x25e   :  { %v1544_v26 = vadd.f32 2.7706815e-08, %v1536_v41  ;;  %v1620_v60 = vadd.f32 -0.016096033, %v1612_v32  ;;  %v1678_v7 = vadd.f32 -0.0073733293, %v1670_v50  ;;  %v1747_v32 = vmul.f32 %v1739_v3, %v1491_v2  ;;  %1839 = vmatpush.msra.mxu3 %v1834_v16 }
 0x25f   :  { %v1591_v28 = vadd.f32 -0.00073499064, %v1583_v30  ;;  %v1833_v30 = vld [vmem:[%s3763_s5 + $0x68] sm:$0xff] }
 0x260   :  { %v1552_v5 = vmul.f32 %v1544_v26, %v3618_v35  ;;  %v1953_v18 = vpop.eup %1952  ;;  %v1628_v41 = vmul.f32 %v3539_v42, %v1620_v60  ;;  %v1686_v26 = vmul.f32 %v1678_v7, %v3585_v53  ;;  %v1655_v42 = vmul.f32 %v1647_v25, %v3602_v52  ;;  %1793 = vmatmul.f32.gmra.mxu2 %v1747_v32 }
 0x261   :  { %v1708_v6 = vmul.f32 %v1953_v18, %v1692_v9  ;;  %v1955_v14 = vpop.eup %1954  ;;  %v1599_v8 = vmul.f32 %v1591_v28, %v3602_v52  ;;  %v1493_v25 = vmul.f32 0.5, %v3542_v61  ;;  %v1832_v61 = vld [vmem:[%s3763_s5 + $0x60] sm:$0xff]  ;;  %1840 = vmatpush.msra.mxu3 %v1833_v30 }
 0x262   :  { %v1560_v19 = vadd.f32 -2.101024e-06, %v1552_v5  ;;  %v1694_v31 = vadd.f32 -0.014264739, %v1686_v26  ;;  %v1663_v43 = vadd.f32 -0.001682827, %v1655_v42  ;;  %v1709_v54 = vmul.f32 %v1955_v14, %v1693_v47 }
 0x263   :  { %v1716_v37 = vsub.f32 2.0, %v1708_v6  ;;  %v1640_v5 = vmul.f32 -1.45660715e-05, %v3618_v35  ;;  %v1607_v15 = vadd.f32 -0.0029546, %v1599_v8  ;;  %1841 = vmatpush.msra.mxu3 %v1832_v61 }
 0x264   :  { %v1568_v9 = vmul.f32 %v1560_v19, %v3618_v35  ;;  %1956 = vrcp.f32 %v1694_v31  ;;  %v1671_v21 = vmul.f32 %v1663_v43, %v3602_v52  ;;  %v1717_v56 = vsub.f32 2.0, %v1709_v54  ;;  %v1829_v54 = vld [vmem:[%s3763_s5 + $0x48] sm:$0xff] }
 0x265   :  { %v1724_v33 = vmul.f32 %v1953_v18, %v1716_v37  ;;  %v1648_v59 = vadd.f32 -0.00021337405, %v1640_v5  ;;  %v1614_v18 = vmul.f32 %v1606_v49, %v3585_v53  ;;  %v1830_v49 = vld [vmem:[%s3763_s5 + $0x50] sm:$0xff] }
 0x266   :  { %v1576_v55 = vadd.f32 -5.6925062e-05, %v1568_v9  ;;  %v1679_v60 = vadd.f32 -0.0073733293, %v1671_v21  ;;  %v1725_v47 = vmul.f32 %v1955_v14, %v1717_v56 }
 0x267   :  { %v1732_v51 = vmul.f32 %v1724_v33, %v1628_v41  ;;  %v1656_v39 = vmul.f32 %v1648_v59, %v3618_v35  ;;  %v1622_v50 = vadd.f32 -0.016096033, %v1614_v18  ;;  %v1615_v33 = vmul.f32 %v1607_v15, %v3602_v52  ;;  %v1821_v15 = vld [vmem:[%s3763_s5 + $0x8] sm:$0xff] }
 0x268   :  { %v1584_v62 = vmul.f32 %v1576_v55, %v3618_v35  ;;  %v1687_v40 = vmul.f32 %v1679_v60, %v3602_v52  ;;  %v1733_v19 = vmul.f32 %v1725_v47, %v1629_v12  ;;  %v1494_v55 = vmul.f32 0.5, %v3563_v57  ;;  %v1827_v57 = vld [vmem:[%s3763_s5 + $0x38] sm:$0xff]  ;;  %v1825_v47 = vld [vmem:[%s3763_s5 + $0x28] sm:$0xff] }
 0x269   :  { %v1740_v46 = vadd.f32 1.0, %v1732_v51  ;;  %v1664_v22 = vadd.f32 -0.001682827, %v1656_v39  ;;  %v1630_v9 = vmul.f32 %v3577_v0, %v1622_v50  ;;  %v1831_v0 = vld [vmem:[%s3763_s5 + $0x58] sm:$0xff]  ;;  %v1623_v52 = vadd.f32 -0.016096033, %v1615_v33 }
 0x26a   :  { %v1957_v6 = vpop.eup %1956  ;;  %v1695_v1 = vadd.f32 -0.014264739, %v1687_v40  ;;  %v1592_v44 = vadd.f32 -0.00073499064, %v1584_v62  ;;  %v1741_v53 = vadd.f32 1.0, %v1733_v19  ;;  %1842 = vmatpush.msra.mxu3 %v1831_v0  ;;  %v1495_v62 = vmul.f32 0.5, %v3580_v24 }
 0x26b   :  { %v1748_v11 = vmul.f32 %v1740_v46, %v1492_v58  ;;  %v1710_v41 = vmul.f32 %v1957_v6, %v1694_v31  ;;  %v1672_v37 = vmul.f32 %v1664_v22, %v3618_v35  ;;  %v1631_v46 = vmul.f32 %v3592_v20, %v1623_v52  ;;  %v1828_v58 = vld [vmem:[%s3763_s5 + $0x40] sm:$0xff]  ;;  %v1822_v50 = vld [vmem:[%s3763_s5 + $0x10] sm:$0xff] }
 0x26c   :  { %1958 = vrcp.f32 %v1695_v1  ;;  %v1600_v2 = vmul.f32 %v1592_v44, %v3618_v35  ;;  %v1749_v26 = vmul.f32 %v1741_v53, %v1493_v25  ;;  %1843 = vmatpush.msra.mxu3 %v1830_v49  ;;  %v1824_v19 = vld [vmem:[%s3763_s5 + $0x20] sm:$0xff]  ;;  %v1496_v22 = vmul.f32 0.5, %v3595_v45 }
 0x26d   :  { %1796 = vmatmul.f32.gmra.mxu2 %v1748_v11  ;;  %v1718_v7 = vsub.f32 2.0, %v1710_v41  ;;  %v1680_v13 = vadd.f32 -0.0073733293, %v1672_v37  ;;  %v1820_v44 = vld [vmem:[%s3763_s5] sm:$0xff] }
 0x26e   :  { %v1608_v32 = vadd.f32 -0.0029546, %v1600_v2  ;;  %1844 = vmatpush.msra.mxu3 %v1829_v54  ;;  %v1944_v45 = vld [vmem:[%s3759_s1 + $0x4] ss:$0 sm:$0xff] }
 0x26f   :  { %v1726_v3 = vmul.f32 %v1957_v6, %v1718_v7  ;;  %v1688_v42 = vmul.f32 %v1680_v13, %v3618_v35 }
 0x270   :  { %v1616_v21 = vmul.f32 %v1608_v32, %v3618_v35  ;;  %1845 = vmatpush.msra.mxu3 %v1828_v58  ;;  %v1826_v35 = vld [vmem:[%s3763_s5 + $0x30] sm:$0xff] }
 0x271   :  { %v1734_v51 = vmul.f32 %v1726_v3, %v1630_v9  ;;  %v1696_v29 = vadd.f32 -0.014264739, %v1688_v42 }
 0x272   :  { %v1959_v14 = vpop.eup %1958  ;;  %v1624_v59 = vadd.f32 -0.016096033, %v1616_v21  ;;  %1846 = vmatpush.msra.mxu3 %v1827_v57 }
 0x273   :  { %v1711_v31 = vmul.f32 %v1959_v14, %v1695_v1  ;;  %v1742_v43 = vadd.f32 1.0, %v1734_v51  ;;  %1960 = vrcp.f32 %v1696_v29  ;;  %v1823_v1 = vld [vmem:[%s3763_s5 + $0x18] sm:$0xff] }
 0x274   :  { %v1632_v11 = vmul.f32 %v3611_v23, %v1624_v59  ;;  %1847 = vmatpush.msra.mxu3 %v1826_v35 }
 0x275   :  { %1799 = vmatmul.f32.gmra.mxu2 %v1749_v26  ;;  %v1719_v28 = vsub.f32 2.0, %v1711_v31  ;;  %v1750_v56 = vmul.f32 %v1742_v43, %v1494_v55 }
 0x276   :  { %1848 = vmatpush.msra.mxu3 %v1825_v47 }
 0x277   :  { %v1727_v5 = vmul.f32 %v1959_v14, %v1719_v28 }
 0x278   :  { %1849 = vmatpush.msra.mxu3 %v1824_v19 }
 0x279   :  { %v1735_v12 = vmul.f32 %v1727_v5, %v1631_v46  ;;  %v1961_v60 = vpop.eup %1960 }
 0x27a   :  { %v1712_v18 = vmul.f32 %v1961_v60, %v1696_v29  ;;  %1850 = vmatpush.msra.mxu3 %v1823_v1 }
 0x27b   :  { %v1743_v20 = vadd.f32 1.0, %v1735_v12 }
 0x27c   :  { %v1720_v8 = vsub.f32 2.0, %v1712_v18  ;;  %1851 = vmatpush.msra.mxu3 %v1822_v50 }
 0x27d   :  { %1802 = vmatmul.f32.gmra.mxu2 %v1750_v56  ;;  %v1751_v39 = vmul.f32 %v1743_v20, %v1495_v62 }
 0x27e   :  { %v1728_v40 = vmul.f32 %v1961_v60, %v1720_v8  ;;  %1852 = vmatpush.msra.mxu3 %v1821_v15 }
 0x280   :  { %v1736_v6 = vmul.f32 %v1728_v40, %v1632_v11  ;;  %1853 = vmatpush.msra.mxu3 %v1820_v44 }
 0x282   :  { %v1744_v24 = vadd.f32 1.0, %v1736_v6 }
 0x284   :  { %v1752_v23 = vmul.f32 %v1744_v24, %v1496_v22 }
 0x285   :  { %1805 = vmatmul.f32.gmra.mxu2 %v1751_v39 }
 0x28d   :  { %1808 = vmatmul.f32.gmra.mxu2 %v1752_v23 }
 0x2ab   :  { %v1788_v41 = vpop.f32.mrf.mxu2 }
 0x2ac   :  { %v1789_v53 = vadd.f32 %v1944_v45, %v1788_v41 }
 0x2ae   :  { %v1812_v37 = vadd.f32 %v1789_v53, %v3144_v27 }
 0x2b0   :  { %1854 = vmatmul.f32.vlgmr.msra.gmra.mxu3 %v1812_v37 }
 0x2b3   :  { %v1791_v38 = vpop.f32.mrf.mxu2 }
 0x2b4   :  { %v1792_v16 = vadd.f32 %v1944_v45, %v1791_v38 }
 0x2b6   :  { %v1813_v7 = vadd.f32 %v1792_v16, %v3147_v48 }
 0x2b8   :  { %1857 = vmatmul.f32.gmra.mxu3 %v1813_v7 }
 0x2e3   :  { %v1794_v25 = vpop.f32.mrf.mxu2 }
 0x2e4   :  { %v1795_v13 = vadd.f32 %v1944_v45, %v1794_v25 }
 0x2e6   :  { %v1814_v30 = vadd.f32 %v1795_v13, %v3308_v63 }
 0x2e8   :  { %1860 = vmatmul.f32.gmra.mxu3 %v1814_v30 }
 0x2f0   :  { %v1797_v9 = vpop.f32.mrf.mxu2 }
 0x2f1   :  { %v1798_v33 = vadd.f32 %v1944_v45, %v1797_v9 }
 0x2f3   :  { %v1815_v2 = vadd.f32 %v1798_v33, %v3391_v17 }
 0x2f5   :  { %1863 = vmatmul.f32.gmra.mxu3 %v1815_v2 }
 0x2f8   :  { %v1800_v3 = vpop.f32.mrf.mxu2 }
 0x2f9   :  { %v1801_v26 = vadd.f32 %v1944_v45, %v1800_v3 }
 0x2fb   :  { %v1816_v27 = vadd.f32 %v1801_v26, %v3414_v4  ;;  %v1945_v4 = vld [vmem:[%s3759_s1 + $0x5] ss:$0 sm:$0xff] }
 0x2fd   :  { %1866 = vmatmul.f32.gmra.mxu3 %v1816_v27 }
 0x300   :  { %v1803_v42 = vpop.f32.mrf.mxu2 }
 0x301   :  { %v1804_v61 = vadd.f32 %v1944_v45, %v1803_v42 }
 0x303   :  { %v1817_v48 = vadd.f32 %v1804_v61, %v3421_v34 }
 0x305   :  { %1869 = vmatmul.f32.gmra.mxu3 %v1817_v48 }
 0x308   :  { %v1806_v51 = vpop.f32.mrf.mxu2 }
 0x309   :  { %v1807_v14 = vadd.f32 %v1944_v45, %v1806_v51 }
 0x30b   :  { %v1818_v63 = vadd.f32 %v1807_v14, %v3427_v10 }
 0x30d   :  { %1872 = vmatmul.f32.gmra.mxu3 %v1818_v63 }
 0x310   :  { %v1809_v29 = vpop.f32.mrf.mxu2 }
 0x311   :  { %v1810_v0 = vadd.f32 %v1944_v45, %v1809_v29 }
 0x313   :  { %v1819_v17 = vadd.f32 %v1810_v0, %v3440_v36 }
 0x315   :  { %1875 = vmatmul.f32.gmra.mxu3 %v1819_v17 }
 0x333   :  { %v1855_v52 = vpop.f32.mrf.mxu3 }
 0x334   :  { %v1856_v32 = vadd.f32 %v1945_v4, %v1855_v52 }
 0x336   :  { %1879 = vst [vmem:[%s3764_s6] sm:$0xff] %v1856_v32 }
 0x33b   :  { %v1858_v34 = vpop.f32.mrf.mxu3 }
 0x33c   :  { %v1859_v31 = vadd.f32 %v1945_v4, %v1858_v34 }
 0x33e   :  { %1880 = vst [vmem:[%s3764_s6 + $0x8] sm:$0xff] %v1859_v31 }
 0x36b   :  { %v1861_v10 = vpop.f32.mrf.mxu3 }
 0x36c   :  { %v1862_v43 = vadd.f32 %v1945_v4, %v1861_v10 }
 0x36e   :  { %1881 = vst [vmem:[%s3764_s6 + $0x10] sm:$0xff] %v1862_v43 }
 0x378   :  { %v1864_v36 = vpop.f32.mrf.mxu3 }
 0x379   :  { %v1865_v49 = vadd.f32 %v1945_v4, %v1864_v36 }
 0x37b   :  { %1882 = vst [vmem:[%s3764_s6 + $0x18] sm:$0xff] %v1865_v49 }
 0x380   :  { %v1867_v28 = vpop.f32.mrf.mxu3 }
 0x381   :  { %v1868_v55 = vadd.f32 %v1945_v4, %v1867_v28 }
 0x383   :  { %1883 = vst [vmem:[%s3764_s6 + $0x20] sm:$0xff] %v1868_v55 }
 0x388   :  { %v1870_v54 = vpop.f32.mrf.mxu3 }
 0x389   :  { %v1871_v46 = vadd.f32 %v1945_v4, %v1870_v54 }
 0x38b   :  { %1884 = vst [vmem:[%s3764_s6 + $0x28] sm:$0xff] %v1871_v46 }
 0x390   :  { %v1873_v21 = vpop.f32.mrf.mxu3 }
 0x391   :  { %v1874_v5 = vadd.f32 %v1945_v4, %v1873_v21 }
 0x393   :  { %1885 = vst [vmem:[%s3764_s6 + $0x30] sm:$0xff] %v1874_v5 }
 0x398   :  { %v1876_v56 = vpop.f32.mrf.mxu3 }
 0x399   :  { %v1877_v58 = vadd.f32 %v1945_v4, %v1876_v56 }
 0x39b   :  { %1886 = vst [vmem:[%s3764_s6 + $0x38] sm:$0xff] %v1877_v58 }
 0x39c   :  { %1891 = vsyncpa [#allocation3], 1 }
 0x39d   :  { %1892 = vsyncpa [#allocation5], 1 }

</bundles_post_ra>
